<compile_context>
chip_gen: v5e
topology: v5e:2x2
jax: 0.10.0
libtpu: 0.0.40
codegen_flags: <defaults>
</compile_context>

<pallas_src>
import functools
import math

import jax
import jax.numpy as jnp
from jax.experimental import pallas as pl
from jax.experimental.pallas import tpu as pltpu

LN_EPS = 1e-5  # torch.nn.LayerNorm default


def _layer_norm(x, gamma, beta):
    mean = jnp.mean(x, axis=-1, keepdims=True)
    var = jnp.mean((x - mean) ** 2, axis=-1, keepdims=True)
    return (x - mean) * jax.lax.rsqrt(var + LN_EPS) * gamma + beta


# ----------------------------------------------------------------------------
# Fused decoder-block kernel: self-attn -> cross-attn -> FFN for one batch block.
# ----------------------------------------------------------------------------
def _decoder_block_kernel(
        dec_ref, enc_ref,
        # self-attention params (combined-head layouts)
        s_wq, s_bq, s_wk, s_bk, s_wv, s_bv, s_wo, s_bo, s_g, s_b,
        # cross-attention params
        c_wq, c_bq, c_wk, c_bk, c_wv, c_bv, c_wo, c_bo, c_g, c_b,
        # feed-forward params
        f_w1, f_b1, f_w2, f_b2, f_g, f_b,
        # outputs
        out_ref, self_attn_ref, cross_attn_ref,
        *, n_head, d_k, d_v, compute_dtype):
    f32 = jnp.float32
    inv_temp = 1.0 / math.sqrt(d_k)
    bb, t_dec, d_model = dec_ref.shape
    t_enc = enc_ref.shape[1]

    def attention(x_rows, tq, kv_rows, tk,
                  wq, bq, wk, bk, wv, bv, wo, bo, gamma, beta, attn_ref):
        # x_rows: (bb*tq, D) f32, kv_rows: (bb*tk, D) f32.
        x_c = x_rows.astype(compute_dtype)
        kv_c = kv_rows.astype(compute_dtype)

        # Combined projections: one D-wide MXU matmul each (f32 accumulation).
        q = jnp.dot(x_c, wq[...], preferred_element_type=f32) + bq[...]
        k = jnp.dot(kv_c, wk[...], preferred_element_type=f32) + bk[...]
        v = jnp.dot(kv_c, wv[...], preferred_element_type=f32) + bv[...]

        # Split heads only for score/context (static lane slices of the packed
        # projections; same MXU push count as a head-batched einsum, no
        # activation transposes / relayouts).
        q3 = q.reshape(bb, tq, n_head * d_k).astype(compute_dtype)
        k3 = k.reshape(bb, tk, n_head * d_k).astype(compute_dtype)
        v3 = v.reshape(bb, tk, n_head * d_v).astype(compute_dtype)

        ctx_heads = []
        for h in range(n_head):
            qh = q3[:, :, h * d_k:(h + 1) * d_k]            # (bb, tq, d_k)
            kh = k3[:, :, h * d_k:(h + 1) * d_k]            # (bb, tk, d_k)
            vh = v3[:, :, h * d_v:(h + 1) * d_v]            # (bb, tk, d_v)
            s = jnp.einsum('bqe,bke->bqk', qh, kh,
                           preferred_element_type=f32) * inv_temp
            s = s - jnp.max(s, axis=-1, keepdims=True)
            e = jnp.exp(s)
            # Exact softmax divide: these weights are an externally visible
            # output (no approx-reciprocal perturbation).
            p = e * (1.0 / jnp.sum(e, axis=-1, keepdims=True))
            attn_ref[:, h] = p.astype(attn_ref.dtype)
            ctx_heads.append(
                jnp.einsum('bqk,bke->bqe', p.astype(compute_dtype), vh,
                           preferred_element_type=f32))       # (bb, tq, d_v)

        # Output projection folded into ONE (rows, H*d_v) @ (H*d_v, D) matmul:
        # ctx heads placed at static lane offsets (d_v-wide slices).
        ctx = jnp.concatenate(ctx_heads, axis=-1).reshape(bb * tq, n_head * d_v)
        out = jnp.dot(ctx.astype(compute_dtype), wo[...],
                      preferred_element_type=f32) + bo[...]
        return _layer_norm(out + x_rows, gamma[...], beta[...])

    # Collapse (batch_block, T) into one row axis for all projections/FFN/LN.
    dec = dec_ref[...].astype(f32).reshape(bb * t_dec, d_model)
    enc = enc_ref[...].astype(f32).reshape(bb * t_enc, d_model)

    out1 = attention(dec, t_dec, dec, t_dec,
                     s_wq, s_bq, s_wk, s_bk, s_wv, s_bv, s_wo, s_bo, s_g, s_b,
                     self_attn_ref)
    out2 = attention(out1, t_dec, enc, t_enc,
                     c_wq, c_bq, c_wk, c_bk, c_wv, c_bv, c_wo, c_bo, c_g, c_b,
                     cross_attn_ref)

    # Position-wise feed-forward (Conv1d k=1 == per-position linear), rows folded.
    h = jnp.dot(out2.astype(compute_dtype), f_w1[...],
                preferred_element_type=f32) + f_b1[...]
    h = jnp.maximum(h, 0.0)
    y = jnp.dot(h.astype(compute_dtype), f_w2[...],
                preferred_element_type=f32) + f_b2[...]
    out3 = _layer_norm(y + out2, f_g[...], f_b[...])
    out_ref[...] = out3.reshape(bb, t_dec, d_model).astype(out_ref.dtype)


# ----------------------------------------------------------------------------
# Wrapper: batch-block grid, pinned weights, bf16 weight cast (free XLA ops).
# ----------------------------------------------------------------------------
def _pick_batch_block(batch, t_dec, max_rows=512):
    # Largest divisor of `batch` such that (a) Bblk*T stays within a
    # VMEM/MXU-friendly row budget and (b) the grid keeps >= 2 steps when
    # batch >= 2, so v7x's two TensorCores both get work via "parallel".
    best = 1
    for d in range(1, batch + 1):
        if batch % d:
            continue
        if d * t_dec > max_rows:
            continue
        if batch >= 2 and batch // d < 2:
            continue
        best = d
    return best


def decoder_block(decode_input, encode_output, params, *, n_head, d_k, d_v,
                  batch_block=None, compute_dtype=jnp.bfloat16,
                  attn_weights_dtype=jnp.float32):
    B, T_dec, D = decode_input.shape
    T_enc = encode_output.shape[1]
    if batch_block is None:
        batch_block = _pick_batch_block(B, T_dec)
    assert B % batch_block == 0

    def mha_weights(p):
        # Matmul weights in compute dtype (MXU operands); biases / LN stay f32.
        return (p['wq'].astype(compute_dtype), p['bq'],
                p['wk'].astype(compute_dtype), p['bk'],
                p['wv'].astype(compute_dtype), p['bv'],
                p['wo'].astype(compute_dtype), p['bo'],
                p['gamma'], p['beta'])

    sa = mha_weights(params['self_attn'])
    ca = mha_weights(params['cross_attn'])
    fp = params['ffn']
    ff = (fp['w1'].astype(compute_dtype), fp['b1'],
          fp['w2'].astype(compute_dtype), fp['b2'],
          fp['gamma'], fp['beta'])

    weights = sa + ca + ff
    args = (decode_input, encode_output) + weights

    def pinned(w):  # full-array block, constant index map (weights stay resident)
        # TODO(synk): on v7x (64 MiB VMEM) with large D/d_inner, single-buffer
        # these pinned blocks (pipeline_mode=pl.Buffered(1), or stage via pl.ANY
        # + one-time copy) to drop the default 2x residency; negligible here.
        return pl.BlockSpec(w.shape, lambda b, _nd=w.ndim: (0,) * _nd)

    in_specs = [
        pl.BlockSpec((batch_block, T_dec, D), lambda b: (b, 0, 0)),   # decode_input
        pl.BlockSpec((batch_block, T_enc, D), lambda b: (b, 0, 0)),   # encode_output
    ] + [pinned(w) for w in weights]

    out_shape = (
        jax.ShapeDtypeStruct((B, T_dec, D), decode_input.dtype),
        jax.ShapeDtypeStruct((B, n_head, T_dec, T_dec), attn_weights_dtype),
        jax.ShapeDtypeStruct((B, n_head, T_dec, T_enc), attn_weights_dtype),
    )
    # TODO(synk): at large T, pad Tk to a multiple of 128 (or emit a flattened
    # lane-dense slab and reshape in the wrapper) so attention-weight stores are
    # unmasked vst; at T_dec=8 / T_enc=16 these outputs are ~2 KB (noise).
    out_specs = (
        pl.BlockSpec((batch_block, T_dec, D), lambda b: (b, 0, 0)),
        pl.BlockSpec((batch_block, n_head, T_dec, T_dec), lambda b: (b, 0, 0, 0)),
        pl.BlockSpec((batch_block, n_head, T_dec, T_enc), lambda b: (b, 0, 0, 0)),
    )

    kernel = functools.partial(_decoder_block_kernel, n_head=n_head, d_k=d_k,
                               d_v=d_v, compute_dtype=compute_dtype)
    return pl.pallas_call(
        kernel,
        out_shape=out_shape,
        grid_spec=pltpu.PrefetchScalarGridSpec(
            num_scalar_prefetch=0,
            grid=(B // batch_block,),
            in_specs=in_specs,
            out_specs=out_specs,
        ),
        compiler_params=pltpu.CompilerParams(
            dimension_semantics=("parallel",),      # batch blocks are independent
            # TODO(synk): re-derive against v7x's 64 MiB VMEM when tiling T.
            vmem_limit_bytes=32 * 1024 * 1024,
        ),
    )(*args)


# ----------------------------------------------------------------------------
# Deterministic parameter init + pure-JAX reference for sanity checking.
# ----------------------------------------------------------------------------
def _init_linear(key, fan_in, fan_out):
    kw, kb = jax.random.split(key)
    s = 1.0 / math.sqrt(fan_in)
    w = jax.random.uniform(kw, (fan_in, fan_out), jnp.float32, -s, s)
    b = jax.random.uniform(kb, (1, fan_out), jnp.float32, -s, s)
    return w, b


def init_params(key, d_model, n_head, d_k, d_v, d_inner):
    keys = jax.random.split(key, 8)

    def mha_params(k4):
        k = jax.random.split(k4, 4)
        wq, bq = _init_linear(k[0], d_model, n_head * d_k)
        wk, bk = _init_linear(k[1], d_model, n_head * d_k)
        wv, bv = _init_linear(k[2], d_model, n_head * d_v)
        wo, bo = _init_linear(k[3], n_head * d_v, d_model)
        return dict(wq=wq, bq=bq, wk=wk, bk=bk, wv=wv, bv=bv, wo=wo, bo=bo,
                    gamma=jnp.ones((1, d_model), jnp.float32),
                    beta=jnp.zeros((1, d_model), jnp.float32))

    w1, b1 = _init_linear(keys[2], d_model, d_inner)
    w2, b2 = _init_linear(keys[3], d_inner, d_model)
    ffn_p = dict(w1=w1, b1=b1, w2=w2, b2=b2,
                 gamma=jnp.ones((1, d_model), jnp.float32),
                 beta=jnp.zeros((1, d_model), jnp.float32))
    return dict(self_attn=mha_params(keys[0]),
                cross_attn=mha_params(keys[1]),
                ffn=ffn_p)


def mha_ref(q_in, kv_in, p, n_head, d_k, d_v):
    q = q_in @ p['wq'] + p['bq']
    k = kv_in @ p['wk'] + p['bk']
    v = kv_in @ p['wv'] + p['bv']
    B, Tq, _ = q.shape
    Tk = k.shape[1]
    q = q.reshape(B, Tq, n_head, d_k).transpose(0, 2, 1, 3)
    k = k.reshape(B, Tk, n_head, d_k).transpose(0, 2, 1, 3)
    v = v.reshape(B, Tk, n_head, d_v).transpose(0, 2, 1, 3)
    scores = jnp.einsum('bhqd,bhkd->bhqk', q, k) / math.sqrt(d_k)
    attn = jax.nn.softmax(scores, axis=-1)
    ctx = jnp.einsum('bhqk,bhkd->bhqd', attn, v)
    ctx = ctx.transpose(0, 2, 1, 3).reshape(B, Tq, n_head * d_v)
    out = ctx @ p['wo'] + p['bo']
    out = _layer_norm(out + q_in, p['gamma'], p['beta'])
    return out, attn


def decoder_block_ref(dec, enc, params, n_head, d_k, d_v):
    out, sw = mha_ref(dec, dec, params['self_attn'], n_head, d_k, d_v)
    out, cw = mha_ref(out, enc, params['cross_attn'], n_head, d_k, d_v)
    p = params['ffn']
    h = jnp.maximum(out @ p['w1'] + p['b1'], 0.0)
    y = h @ p['w2'] + p['b2']
    out2 = _layer_norm(y + out, p['gamma'], p['beta'])
    return out2, sw, cw


if __name__ == "__main__":
    d_model, n_head, d_k, d_v, d_inner = 32, 4, 8, 8, 64
    B, T_dec, T_enc = 2, 8, 16

    key = jax.random.PRNGKey(0)
    k_dec, k_enc, k_par = jax.random.split(key, 3)
    decode_input = jax.random.normal(k_dec, (B, T_dec, d_model), jnp.float32)
    encode_output = jax.random.normal(k_enc, (B, T_enc, d_model), jnp.float32)
    params = init_params(k_par, d_model, n_head, d_k, d_v, d_inner)

    ref_out, ref_sw, ref_cw = decoder_block_ref(decode_input, encode_output,
                                                params, n_head, d_k, d_v)

    # 1) f32-operand run: tight correctness gate against the pure-JAX reference.
    out32, sw32, cw32 = decoder_block(decode_input, encode_output, params,
                                      n_head=n_head, d_k=d_k, d_v=d_v,
                                      compute_dtype=jnp.float32)
    jax.block_until_ready((out32, sw32, cw32))
    assert out32.shape == (B, T_dec, d_model)
    assert sw32.shape == (B, n_head, T_dec, T_dec)
    assert cw32.shape == (B, n_head, T_dec, T_enc)
    assert jnp.allclose(out32, ref_out, atol=2e-3, rtol=2e-3)
    assert jnp.allclose(sw32, ref_sw, atol=2e-3, rtol=2e-3)
    assert jnp.allclose(cw32, ref_cw, atol=2e-3, rtol=2e-3)

    # 2) Default fast path: bf16 MXU operands, f32 accumulation / LN / softmax.
    out, self_w, cross_w = decoder_block(decode_input, encode_output, params,
                                         n_head=n_head, d_k=d_k, d_v=d_v)
    jax.block_until_ready((out, self_w, cross_w))
    assert jnp.allclose(out, ref_out, atol=5e-2, rtol=5e-2)        # bf16 rounding
    assert jnp.allclose(self_w, ref_sw, atol=2.5e-2, rtol=2.5e-2)
    assert jnp.allclose(cross_w, ref_cw, atol=2.5e-2, rtol=2.5e-2)

    print("KERNEL_OK")
</pallas_src>

<mosaic_0001>
module attributes {stable_mosaic.version = 11 : i64} {
  func.func @_decoder_block_kernel(%arg0: i32, %arg1: memref<1x8x32xf32, #tpu.memory_space<vmem>>, %arg2: memref<1x16x32xf32, #tpu.memory_space<vmem>>, %arg3: memref<32x32xf32, #tpu.memory_space<vmem>>, %arg4: memref<1x32xf32, #tpu.memory_space<vmem>>, %arg5: memref<32x32xf32, #tpu.memory_space<vmem>>, %arg6: memref<1x32xf32, #tpu.memory_space<vmem>>, %arg7: memref<32x32xf32, #tpu.memory_space<vmem>>, %arg8: memref<1x32xf32, #tpu.memory_space<vmem>>, %arg9: memref<32x32xf32, #tpu.memory_space<vmem>>, %arg10: memref<1x32xf32, #tpu.memory_space<vmem>>, %arg11: memref<1x32xf32, #tpu.memory_space<vmem>>, %arg12: memref<1x32xf32, #tpu.memory_space<vmem>>, %arg13: memref<32x32xf32, #tpu.memory_space<vmem>>, %arg14: memref<1x32xf32, #tpu.memory_space<vmem>>, %arg15: memref<32x32xf32, #tpu.memory_space<vmem>>, %arg16: memref<1x32xf32, #tpu.memory_space<vmem>>, %arg17: memref<32x32xf32, #tpu.memory_space<vmem>>, %arg18: memref<1x32xf32, #tpu.memory_space<vmem>>, %arg19: memref<32x32xf32, #tpu.memory_space<vmem>>, %arg20: memref<1x32xf32, #tpu.memory_space<vmem>>, %arg21: memref<1x32xf32, #tpu.memory_space<vmem>>, %arg22: memref<1x32xf32, #tpu.memory_space<vmem>>, %arg23: memref<32x64xf32, #tpu.memory_space<vmem>>, %arg24: memref<1x64xf32, #tpu.memory_space<vmem>>, %arg25: memref<64x32xf32, #tpu.memory_space<vmem>>, %arg26: memref<1x32xf32, #tpu.memory_space<vmem>>, %arg27: memref<1x32xf32, #tpu.memory_space<vmem>>, %arg28: memref<1x32xf32, #tpu.memory_space<vmem>>, %arg29: memref<1x8x32xf32, #tpu.memory_space<vmem>>, %arg30: memref<1x4x8x8xf32, #tpu.memory_space<vmem>>, %arg31: memref<1x4x8x16xf32, #tpu.memory_space<vmem>>) attributes {dimension_semantics = [#tpu.dimension_semantics<parallel>], iteration_bounds = array<i64: 2>, scalar_prefetch = 0 : i64, scratch_operands = 0 : i64, tpu.core_type = #tpu.core_type<tc>, window_params = [{transform_indices = @transform_0, window_bounds = array<i64: 1, 8, 32>}, {transform_indices = @transform_1, window_bounds = array<i64: 1, 16, 32>}, {pipeline_mode = #tpu.pipeline_mode<synchronous>, transform_indices = @transform_2, window_bounds = array<i64: 32, 32>}, {pipeline_mode = #tpu.pipeline_mode<synchronous>, transform_indices = @transform_3, window_bounds = array<i64: 1, 32>}, {pipeline_mode = #tpu.pipeline_mode<synchronous>, transform_indices = @transform_4, window_bounds = array<i64: 32, 32>}, {pipeline_mode = #tpu.pipeline_mode<synchronous>, transform_indices = @transform_5, window_bounds = array<i64: 1, 32>}, {pipeline_mode = #tpu.pipeline_mode<synchronous>, transform_indices = @transform_6, window_bounds = array<i64: 32, 32>}, {pipeline_mode = #tpu.pipeline_mode<synchronous>, transform_indices = @transform_7, window_bounds = array<i64: 1, 32>}, {pipeline_mode = #tpu.pipeline_mode<synchronous>, transform_indices = @transform_8, window_bounds = array<i64: 32, 32>}, {pipeline_mode = #tpu.pipeline_mode<synchronous>, transform_indices = @transform_9, window_bounds = array<i64: 1, 32>}, {pipeline_mode = #tpu.pipeline_mode<synchronous>, transform_indices = @transform_10, window_bounds = array<i64: 1, 32>}, {pipeline_mode = #tpu.pipeline_mode<synchronous>, transform_indices = @transform_11, window_bounds = array<i64: 1, 32>}, {pipeline_mode = #tpu.pipeline_mode<synchronous>, transform_indices = @transform_12, window_bounds = array<i64: 32, 32>}, {pipeline_mode = #tpu.pipeline_mode<synchronous>, transform_indices = @transform_13, window_bounds = array<i64: 1, 32>}, {pipeline_mode = #tpu.pipeline_mode<synchronous>, transform_indices = @transform_14, window_bounds = array<i64: 32, 32>}, {pipeline_mode = #tpu.pipeline_mode<synchronous>, transform_indices = @transform_15, window_bounds = array<i64: 1, 32>}, {pipeline_mode = #tpu.pipeline_mode<synchronous>, transform_indices = @transform_16, window_bounds = array<i64: 32, 32>}, {pipeline_mode = #tpu.pipeline_mode<synchronous>, transform_indices = @transform_17, window_bounds = array<i64: 1, 32>}, {pipeline_mode = #tpu.pipeline_mode<synchronous>, transform_indices = @transform_18, window_bounds = array<i64: 32, 32>}, {pipeline_mode = #tpu.pipeline_mode<synchronous>, transform_indices = @transform_19, window_bounds = array<i64: 1, 32>}, {pipeline_mode = #tpu.pipeline_mode<synchronous>, transform_indices = @transform_20, window_bounds = array<i64: 1, 32>}, {pipeline_mode = #tpu.pipeline_mode<synchronous>, transform_indices = @transform_21, window_bounds = array<i64: 1, 32>}, {pipeline_mode = #tpu.pipeline_mode<synchronous>, transform_indices = @transform_22, window_bounds = array<i64: 32, 64>}, {pipeline_mode = #tpu.pipeline_mode<synchronous>, transform_indices = @transform_23, window_bounds = array<i64: 1, 64>}, {pipeline_mode = #tpu.pipeline_mode<synchronous>, transform_indices = @transform_24, window_bounds = array<i64: 64, 32>}, {pipeline_mode = #tpu.pipeline_mode<synchronous>, transform_indices = @transform_25, window_bounds = array<i64: 1, 32>}, {pipeline_mode = #tpu.pipeline_mode<synchronous>, transform_indices = @transform_26, window_bounds = array<i64: 1, 32>}, {pipeline_mode = #tpu.pipeline_mode<synchronous>, transform_indices = @transform_27, window_bounds = array<i64: 1, 32>}, {transform_indices = @transform_28, window_bounds = array<i64: 1, 8, 32>}, {transform_indices = @transform_29, window_bounds = array<i64: 1, 4, 8, 8>}, {transform_indices = @transform_30, window_bounds = array<i64: 1, 4, 8, 16>}]} {
    %c0 = arith.constant 0 : index
    %c0_0 = arith.constant 0 : index
    %c0_1 = arith.constant 0 : index
    %0 = vector.load %arg1[%c0, %c0_0, %c0_1] : memref<1x8x32xf32, #tpu.memory_space<vmem>>, vector<1x8x32xf32>
    %1 = vector.shape_cast %0 : vector<1x8x32xf32> to vector<8x32xf32>
    %c0_2 = arith.constant 0 : index
    %c0_3 = arith.constant 0 : index
    %c0_4 = arith.constant 0 : index
    %2 = vector.load %arg2[%c0_2, %c0_3, %c0_4] : memref<1x16x32xf32, #tpu.memory_space<vmem>>, vector<1x16x32xf32>
    %3 = vector.shape_cast %2 : vector<1x16x32xf32> to vector<16x32xf32>
    %c0_5 = arith.constant 0 : index
    %c0_6 = arith.constant 0 : index
    %4 = vector.load %arg3[%c0_5, %c0_6] : memref<32x32xf32, #tpu.memory_space<vmem>>, vector<32x32xf32>
    %cst = arith.constant dense<0.000000e+00> : vector<8x32xf32>
    %5 = tpu.matmul %1, %4, %cst {dimension_numbers = #tpu.dot_dimension_numbers<[1], [0], [0], [1], [0, 0, 1, 1], [], []>} : vector<8x32xf32>, vector<32x32xf32>, vector<8x32xf32> -> vector<8x32xf32>
    %c0_7 = arith.constant 0 : index
    %c0_8 = arith.constant 0 : index
    %6 = vector.load %arg4[%c0_7, %c0_8] : memref<1x32xf32, #tpu.memory_space<vmem>>, vector<1x32xf32>
    %7 = vector.broadcast %6 : vector<1x32xf32> to vector<8x32xf32>
    %8 = arith.addf %5, %7 : vector<8x32xf32>
    %c0_9 = arith.constant 0 : index
    %c0_10 = arith.constant 0 : index
    %9 = vector.load %arg5[%c0_9, %c0_10] : memref<32x32xf32, #tpu.memory_space<vmem>>, vector<32x32xf32>
    %cst_11 = arith.constant dense<0.000000e+00> : vector<8x32xf32>
    %10 = tpu.matmul %1, %9, %cst_11 {dimension_numbers = #tpu.dot_dimension_numbers<[1], [0], [0], [1], [0, 0, 1, 1], [], []>} : vector<8x32xf32>, vector<32x32xf32>, vector<8x32xf32> -> vector<8x32xf32>
    %c0_12 = arith.constant 0 : index
    %c0_13 = arith.constant 0 : index
    %11 = vector.load %arg6[%c0_12, %c0_13] : memref<1x32xf32, #tpu.memory_space<vmem>>, vector<1x32xf32>
    %12 = vector.broadcast %11 : vector<1x32xf32> to vector<8x32xf32>
    %13 = arith.addf %10, %12 : vector<8x32xf32>
    %c0_14 = arith.constant 0 : index
    %c0_15 = arith.constant 0 : index
    %14 = vector.load %arg7[%c0_14, %c0_15] : memref<32x32xf32, #tpu.memory_space<vmem>>, vector<32x32xf32>
    %cst_16 = arith.constant dense<0.000000e+00> : vector<8x32xf32>
    %15 = tpu.matmul %1, %14, %cst_16 {dimension_numbers = #tpu.dot_dimension_numbers<[1], [0], [0], [1], [0, 0, 1, 1], [], []>} : vector<8x32xf32>, vector<32x32xf32>, vector<8x32xf32> -> vector<8x32xf32>
    %c0_17 = arith.constant 0 : index
    %c0_18 = arith.constant 0 : index
    %16 = vector.load %arg8[%c0_17, %c0_18] : memref<1x32xf32, #tpu.memory_space<vmem>>, vector<1x32xf32>
    %17 = vector.broadcast %16 : vector<1x32xf32> to vector<8x32xf32>
    %18 = arith.addf %15, %17 : vector<8x32xf32>
    %19 = vector.shape_cast %8 : vector<8x32xf32> to vector<1x8x32xf32>
    %20 = vector.shape_cast %13 : vector<8x32xf32> to vector<1x8x32xf32>
    %21 = vector.shape_cast %18 : vector<8x32xf32> to vector<1x8x32xf32>
    %22 = vector.extract_strided_slice %19 {offsets = [0, 0, 0], sizes = [1, 8, 8], strides = [1, 1, 1]} : vector<1x8x32xf32> to vector<1x8x8xf32>
    %23 = vector.extract_strided_slice %20 {offsets = [0, 0, 0], sizes = [1, 8, 8], strides = [1, 1, 1]} : vector<1x8x32xf32> to vector<1x8x8xf32>
    %24 = vector.extract_strided_slice %21 {offsets = [0, 0, 0], sizes = [1, 8, 8], strides = [1, 1, 1]} : vector<1x8x32xf32> to vector<1x8x8xf32>
    "tpu.trace_start"() <{level = 10 : i32, message = "bqe,bke->bqk"}> : () -> ()
    %cst_19 = arith.constant dense<0.000000e+00> : vector<1x8x8xf32>
    %25 = tpu.matmul %22, %23, %cst_19 {dimension_numbers = #tpu.dot_dimension_numbers<[2], [2], [1], [1], [0, 0, 0, 1, 1, 1], [0], [0]>} : vector<1x8x8xf32>, vector<1x8x8xf32>, vector<1x8x8xf32> -> vector<1x8x8xf32>
    "tpu.trace_stop"() : () -> ()
    %cst_20 = arith.constant 0.353553385 : f32
    %26 = vector.broadcast %cst_20 : f32 to vector<1x8x8xf32>
    %27 = arith.mulf %25, %26 : vector<1x8x8xf32>
    %cst_21 = arith.constant dense<0xFF800000> : vector<1x8xf32>
    %28 = vector.multi_reduction <maximumf>, %27, %cst_21 [2] : vector<1x8x8xf32> to vector<1x8xf32>
    %29 = vector.shape_cast %28 : vector<1x8xf32> to vector<1x8x1xf32>
    %30 = vector.broadcast %29 : vector<1x8x1xf32> to vector<1x8x8xf32>
    %31 = arith.subf %27, %30 : vector<1x8x8xf32>
    %32 = math.exp %31 : vector<1x8x8xf32>
    %cst_22 = arith.constant dense<0.000000e+00> : vector<1x8xf32>
    %33 = vector.multi_reduction <add>, %32, %cst_22 [2] : vector<1x8x8xf32> to vector<1x8xf32>
    %34 = vector.shape_cast %33 : vector<1x8xf32> to vector<1x8x1xf32>
    %cst_23 = arith.constant 1.000000e+00 : f32
    %35 = vector.broadcast %cst_23 : f32 to vector<1x8x1xf32>
    %36 = arith.divf %35, %34 : vector<1x8x1xf32>
    %37 = vector.broadcast %36 : vector<1x8x1xf32> to vector<1x8x8xf32>
    %38 = arith.mulf %32, %37 : vector<1x8x8xf32>
    %c0_24 = arith.constant 0 : index
    %c0_25 = arith.constant 0 : index
    %c0_26 = arith.constant 0 : index
    %c0_27 = arith.constant 0 : index
    %39 = vector.load %arg30[%c0_24, %c0_25, %c0_26, %c0_27] : memref<1x4x8x8xf32, #tpu.memory_space<vmem>>, vector<1x1x8x8xf32>
    %40 = vector.shape_cast %39 : vector<1x1x8x8xf32> to vector<1x8x8xf32>
    %41 = vector.shape_cast %38 : vector<1x8x8xf32> to vector<1x1x8x8xf32>
    tpu.vector_store %arg30[%c0_24, %c0_25, %c0_26, %c0_27], %41 {strides = array<i32>} : memref<1x4x8x8xf32, #tpu.memory_space<vmem>>, vector<1x1x8x8xf32>,
    "tpu.trace_start"() <{level = 10 : i32, message = "bqk,bke->bqe"}> : () -> ()
    %cst_28 = arith.constant dense<0.000000e+00> : vector<1x8x8xf32>
    %42 = tpu.matmul %38, %24, %cst_28 {dimension_numbers = #tpu.dot_dimension_numbers<[2], [1], [1], [2], [0, 0, 0, 1, 1, 2], [0], [0]>} : vector<1x8x8xf32>, vector<1x8x8xf32>, vector<1x8x8xf32> -> vector<1x8x8xf32>
    "tpu.trace_stop"() : () -> ()
    %43 = vector.extract_strided_slice %19 {offsets = [0, 0, 8], sizes = [1, 8, 8], strides = [1, 1, 1]} : vector<1x8x32xf32> to vector<1x8x8xf32>
    %44 = vector.extract_strided_slice %20 {offsets = [0, 0, 8], sizes = [1, 8, 8], strides = [1, 1, 1]} : vector<1x8x32xf32> to vector<1x8x8xf32>
    %45 = vector.extract_strided_slice %21 {offsets = [0, 0, 8], sizes = [1, 8, 8], strides = [1, 1, 1]} : vector<1x8x32xf32> to vector<1x8x8xf32>
    "tpu.trace_start"() <{level = 10 : i32, message = "bqe,bke->bqk"}> : () -> ()
    %cst_29 = arith.constant dense<0.000000e+00> : vector<1x8x8xf32>
    %46 = tpu.matmul %43, %44, %cst_29 {dimension_numbers = #tpu.dot_dimension_numbers<[2], [2], [1], [1], [0, 0, 0, 1, 1, 1], [0], [0]>} : vector<1x8x8xf32>, vector<1x8x8xf32>, vector<1x8x8xf32> -> vector<1x8x8xf32>
    "tpu.trace_stop"() : () -> ()
    %cst_30 = arith.constant 0.353553385 : f32
    %47 = vector.broadcast %cst_30 : f32 to vector<1x8x8xf32>
    %48 = arith.mulf %46, %47 : vector<1x8x8xf32>
    %cst_31 = arith.constant dense<0xFF800000> : vector<1x8xf32>
    %49 = vector.multi_reduction <maximumf>, %48, %cst_31 [2] : vector<1x8x8xf32> to vector<1x8xf32>
    %50 = vector.shape_cast %49 : vector<1x8xf32> to vector<1x8x1xf32>
    %51 = vector.broadcast %50 : vector<1x8x1xf32> to vector<1x8x8xf32>
    %52 = arith.subf %48, %51 : vector<1x8x8xf32>
    %53 = math.exp %52 : vector<1x8x8xf32>
    %cst_32 = arith.constant dense<0.000000e+00> : vector<1x8xf32>
    %54 = vector.multi_reduction <add>, %53, %cst_32 [2] : vector<1x8x8xf32> to vector<1x8xf32>
    %55 = vector.shape_cast %54 : vector<1x8xf32> to vector<1x8x1xf32>
    %cst_33 = arith.constant 1.000000e+00 : f32
    %56 = vector.broadcast %cst_33 : f32 to vector<1x8x1xf32>
    %57 = arith.divf %56, %55 : vector<1x8x1xf32>
    %58 = vector.broadcast %57 : vector<1x8x1xf32> to vector<1x8x8xf32>
    %59 = arith.mulf %53, %58 : vector<1x8x8xf32>
    %c0_34 = arith.constant 0 : index
    %c1 = arith.constant 1 : index
    %c0_35 = arith.constant 0 : index
    %c0_36 = arith.constant 0 : index
    %60 = vector.load %arg30[%c0_34, %c1, %c0_35, %c0_36] : memref<1x4x8x8xf32, #tpu.memory_space<vmem>>, vector<1x1x8x8xf32>
    %61 = vector.shape_cast %60 : vector<1x1x8x8xf32> to vector<1x8x8xf32>
    %62 = vector.shape_cast %59 : vector<1x8x8xf32> to vector<1x1x8x8xf32>
    tpu.vector_store %arg30[%c0_34, %c1, %c0_35, %c0_36], %62 {strides = array<i32>} : memref<1x4x8x8xf32, #tpu.memory_space<vmem>>, vector<1x1x8x8xf32>,
    "tpu.trace_start"() <{level = 10 : i32, message = "bqk,bke->bqe"}> : () -> ()
    %cst_37 = arith.constant dense<0.000000e+00> : vector<1x8x8xf32>
    %63 = tpu.matmul %59, %45, %cst_37 {dimension_numbers = #tpu.dot_dimension_numbers<[2], [1], [1], [2], [0, 0, 0, 1, 1, 2], [0], [0]>} : vector<1x8x8xf32>, vector<1x8x8xf32>, vector<1x8x8xf32> -> vector<1x8x8xf32>
    "tpu.trace_stop"() : () -> ()
    %64 = vector.extract_strided_slice %19 {offsets = [0, 0, 16], sizes = [1, 8, 8], strides = [1, 1, 1]} : vector<1x8x32xf32> to vector<1x8x8xf32>
    %65 = vector.extract_strided_slice %20 {offsets = [0, 0, 16], sizes = [1, 8, 8], strides = [1, 1, 1]} : vector<1x8x32xf32> to vector<1x8x8xf32>
    %66 = vector.extract_strided_slice %21 {offsets = [0, 0, 16], sizes = [1, 8, 8], strides = [1, 1, 1]} : vector<1x8x32xf32> to vector<1x8x8xf32>
    "tpu.trace_start"() <{level = 10 : i32, message = "bqe,bke->bqk"}> : () -> ()
    %cst_38 = arith.constant dense<0.000000e+00> : vector<1x8x8xf32>
    %67 = tpu.matmul %64, %65, %cst_38 {dimension_numbers = #tpu.dot_dimension_numbers<[2], [2], [1], [1], [0, 0, 0, 1, 1, 1], [0], [0]>} : vector<1x8x8xf32>, vector<1x8x8xf32>, vector<1x8x8xf32> -> vector<1x8x8xf32>
    "tpu.trace_stop"() : () -> ()
    %cst_39 = arith.constant 0.353553385 : f32
    %68 = vector.broadcast %cst_39 : f32 to vector<1x8x8xf32>
    %69 = arith.mulf %67, %68 : vector<1x8x8xf32>
    %cst_40 = arith.constant dense<0xFF800000> : vector<1x8xf32>
    %70 = vector.multi_reduction <maximumf>, %69, %cst_40 [2] : vector<1x8x8xf32> to vector<1x8xf32>
    %71 = vector.shape_cast %70 : vector<1x8xf32> to vector<1x8x1xf32>
    %72 = vector.broadcast %71 : vector<1x8x1xf32> to vector<1x8x8xf32>
    %73 = arith.subf %69, %72 : vector<1x8x8xf32>
    %74 = math.exp %73 : vector<1x8x8xf32>
    %cst_41 = arith.constant dense<0.000000e+00> : vector<1x8xf32>
    %75 = vector.multi_reduction <add>, %74, %cst_41 [2] : vector<1x8x8xf32> to vector<1x8xf32>
    %76 = vector.shape_cast %75 : vector<1x8xf32> to vector<1x8x1xf32>
    %cst_42 = arith.constant 1.000000e+00 : f32
    %77 = vector.broadcast %cst_42 : f32 to vector<1x8x1xf32>
    %78 = arith.divf %77, %76 : vector<1x8x1xf32>
    %79 = vector.broadcast %78 : vector<1x8x1xf32> to vector<1x8x8xf32>
    %80 = arith.mulf %74, %79 : vector<1x8x8xf32>
    %c0_43 = arith.constant 0 : index
    %c2 = arith.constant 2 : index
    %c0_44 = arith.constant 0 : index
    %c0_45 = arith.constant 0 : index
    %81 = vector.load %arg30[%c0_43, %c2, %c0_44, %c0_45] : memref<1x4x8x8xf32, #tpu.memory_space<vmem>>, vector<1x1x8x8xf32>
    %82 = vector.shape_cast %81 : vector<1x1x8x8xf32> to vector<1x8x8xf32>
    %83 = vector.shape_cast %80 : vector<1x8x8xf32> to vector<1x1x8x8xf32>
    tpu.vector_store %arg30[%c0_43, %c2, %c0_44, %c0_45], %83 {strides = array<i32>} : memref<1x4x8x8xf32, #tpu.memory_space<vmem>>, vector<1x1x8x8xf32>,
    "tpu.trace_start"() <{level = 10 : i32, message = "bqk,bke->bqe"}> : () -> ()
    %cst_46 = arith.constant dense<0.000000e+00> : vector<1x8x8xf32>
    %84 = tpu.matmul %80, %66, %cst_46 {dimension_numbers = #tpu.dot_dimension_numbers<[2], [1], [1], [2], [0, 0, 0, 1, 1, 2], [0], [0]>} : vector<1x8x8xf32>, vector<1x8x8xf32>, vector<1x8x8xf32> -> vector<1x8x8xf32>
    "tpu.trace_stop"() : () -> ()
    %85 = vector.extract_strided_slice %19 {offsets = [0, 0, 24], sizes = [1, 8, 8], strides = [1, 1, 1]} : vector<1x8x32xf32> to vector<1x8x8xf32>
    %86 = vector.extract_strided_slice %20 {offsets = [0, 0, 24], sizes = [1, 8, 8], strides = [1, 1, 1]} : vector<1x8x32xf32> to vector<1x8x8xf32>
    %87 = vector.extract_strided_slice %21 {offsets = [0, 0, 24], sizes = [1, 8, 8], strides = [1, 1, 1]} : vector<1x8x32xf32> to vector<1x8x8xf32>
    "tpu.trace_start"() <{level = 10 : i32, message = "bqe,bke->bqk"}> : () -> ()
    %cst_47 = arith.constant dense<0.000000e+00> : vector<1x8x8xf32>
    %88 = tpu.matmul %85, %86, %cst_47 {dimension_numbers = #tpu.dot_dimension_numbers<[2], [2], [1], [1], [0, 0, 0, 1, 1, 1], [0], [0]>} : vector<1x8x8xf32>, vector<1x8x8xf32>, vector<1x8x8xf32> -> vector<1x8x8xf32>
    "tpu.trace_stop"() : () -> ()
    %cst_48 = arith.constant 0.353553385 : f32
    %89 = vector.broadcast %cst_48 : f32 to vector<1x8x8xf32>
    %90 = arith.mulf %88, %89 : vector<1x8x8xf32>
    %cst_49 = arith.constant dense<0xFF800000> : vector<1x8xf32>
    %91 = vector.multi_reduction <maximumf>, %90, %cst_49 [2] : vector<1x8x8xf32> to vector<1x8xf32>
    %92 = vector.shape_cast %91 : vector<1x8xf32> to vector<1x8x1xf32>
    %93 = vector.broadcast %92 : vector<1x8x1xf32> to vector<1x8x8xf32>
    %94 = arith.subf %90, %93 : vector<1x8x8xf32>
    %95 = math.exp %94 : vector<1x8x8xf32>
    %cst_50 = arith.constant dense<0.000000e+00> : vector<1x8xf32>
    %96 = vector.multi_reduction <add>, %95, %cst_50 [2] : vector<1x8x8xf32> to vector<1x8xf32>
    %97 = vector.shape_cast %96 : vector<1x8xf32> to vector<1x8x1xf32>
    %cst_51 = arith.constant 1.000000e+00 : f32
    %98 = vector.broadcast %cst_51 : f32 to vector<1x8x1xf32>
    %99 = arith.divf %98, %97 : vector<1x8x1xf32>
    %100 = vector.broadcast %99 : vector<1x8x1xf32> to vector<1x8x8xf32>
    %101 = arith.mulf %95, %100 : vector<1x8x8xf32>
    %c0_52 = arith.constant 0 : index
    %c3 = arith.constant 3 : index
    %c0_53 = arith.constant 0 : index
    %c0_54 = arith.constant 0 : index
    %102 = vector.load %arg30[%c0_52, %c3, %c0_53, %c0_54] : memref<1x4x8x8xf32, #tpu.memory_space<vmem>>, vector<1x1x8x8xf32>
    %103 = vector.shape_cast %102 : vector<1x1x8x8xf32> to vector<1x8x8xf32>
    %104 = vector.shape_cast %101 : vector<1x8x8xf32> to vector<1x1x8x8xf32>
    tpu.vector_store %arg30[%c0_52, %c3, %c0_53, %c0_54], %104 {strides = array<i32>} : memref<1x4x8x8xf32, #tpu.memory_space<vmem>>, vector<1x1x8x8xf32>,
    "tpu.trace_start"() <{level = 10 : i32, message = "bqk,bke->bqe"}> : () -> ()
    %cst_55 = arith.constant dense<0.000000e+00> : vector<1x8x8xf32>
    %105 = tpu.matmul %101, %87, %cst_55 {dimension_numbers = #tpu.dot_dimension_numbers<[2], [1], [1], [2], [0, 0, 0, 1, 1, 2], [0], [0]>} : vector<1x8x8xf32>, vector<1x8x8xf32>, vector<1x8x8xf32> -> vector<1x8x8xf32>
    "tpu.trace_stop"() : () -> ()
    %106 = tpu.concatenate %42, %63, %84, %105 in 2 : vector<1x8x8xf32>, vector<1x8x8xf32>, vector<1x8x8xf32>, vector<1x8x8xf32> -> vector<1x8x32xf32>
    %107 = vector.shape_cast %106 : vector<1x8x32xf32> to vector<8x32xf32>
    %c0_56 = arith.constant 0 : index
    %c0_57 = arith.constant 0 : index
    %108 = vector.load %arg9[%c0_56, %c0_57] : memref<32x32xf32, #tpu.memory_space<vmem>>, vector<32x32xf32>
    %cst_58 = arith.constant dense<0.000000e+00> : vector<8x32xf32>
    %109 = tpu.matmul %107, %108, %cst_58 {dimension_numbers = #tpu.dot_dimension_numbers<[1], [0], [0], [1], [0, 0, 1, 1], [], []>} : vector<8x32xf32>, vector<32x32xf32>, vector<8x32xf32> -> vector<8x32xf32>
    %c0_59 = arith.constant 0 : index
    %c0_60 = arith.constant 0 : index
    %110 = vector.load %arg10[%c0_59, %c0_60] : memref<1x32xf32, #tpu.memory_space<vmem>>, vector<1x32xf32>
    %111 = vector.broadcast %110 : vector<1x32xf32> to vector<8x32xf32>
    %112 = arith.addf %109, %111 : vector<8x32xf32>
    %113 = arith.addf %112, %1 : vector<8x32xf32>
    %c0_61 = arith.constant 0 : index
    %c0_62 = arith.constant 0 : index
    %114 = vector.load %arg11[%c0_61, %c0_62] : memref<1x32xf32, #tpu.memory_space<vmem>>, vector<1x32xf32>
    %c0_63 = arith.constant 0 : index
    %c0_64 = arith.constant 0 : index
    %115 = vector.load %arg12[%c0_63, %c0_64] : memref<1x32xf32, #tpu.memory_space<vmem>>, vector<1x32xf32>
    %cst_65 = arith.constant dense<0.000000e+00> : vector<8xf32>
    %116 = vector.multi_reduction <add>, %113, %cst_65 [1] : vector<8x32xf32> to vector<8xf32>
    %117 = vector.shape_cast %116 : vector<8xf32> to vector<8x1xf32>
    %cst_66 = arith.constant 3.200000e+01 : f32
    %118 = vector.broadcast %cst_66 : f32 to vector<8x1xf32>
    %119 = arith.divf %117, %118 : vector<8x1xf32>
    %120 = vector.broadcast %119 : vector<8x1xf32> to vector<8x32xf32>
    %121 = arith.subf %113, %120 : vector<8x32xf32>
    %122 = arith.mulf %121, %121 : vector<8x32xf32>
    %cst_67 = arith.constant dense<0.000000e+00> : vector<8xf32>
    %123 = vector.multi_reduction <add>, %122, %cst_67 [1] : vector<8x32xf32> to vector<8xf32>
    %124 = vector.shape_cast %123 : vector<8xf32> to vector<8x1xf32>
    %cst_68 = arith.constant 3.200000e+01 : f32
    %125 = vector.broadcast %cst_68 : f32 to vector<8x1xf32>
    %126 = arith.divf %124, %125 : vector<8x1xf32>
    %127 = vector.broadcast %119 : vector<8x1xf32> to vector<8x32xf32>
    %128 = arith.subf %113, %127 : vector<8x32xf32>
    %cst_69 = arith.constant 9.99999974E-6 : f32
    %129 = vector.broadcast %cst_69 : f32 to vector<8x1xf32>
    %130 = arith.addf %126, %129 : vector<8x1xf32>
    %131 = math.rsqrt %130 : vector<8x1xf32>
    %132 = vector.broadcast %131 : vector<8x1xf32> to vector<8x32xf32>
    %133 = arith.mulf %128, %132 : vector<8x32xf32>
    %134 = vector.broadcast %114 : vector<1x32xf32> to vector<8x32xf32>
    %135 = arith.mulf %133, %134 : vector<8x32xf32>
    %136 = vector.broadcast %115 : vector<1x32xf32> to vector<8x32xf32>
    %137 = arith.addf %135, %136 : vector<8x32xf32>
    %c0_70 = arith.constant 0 : index
    %c0_71 = arith.constant 0 : index
    %138 = vector.load %arg13[%c0_70, %c0_71] : memref<32x32xf32, #tpu.memory_space<vmem>>, vector<32x32xf32>
    %cst_72 = arith.constant dense<0.000000e+00> : vector<8x32xf32>
    %139 = tpu.matmul %137, %138, %cst_72 {dimension_numbers = #tpu.dot_dimension_numbers<[1], [0], [0], [1], [0, 0, 1, 1], [], []>} : vector<8x32xf32>, vector<32x32xf32>, vector<8x32xf32> -> vector<8x32xf32>
    %c0_73 = arith.constant 0 : index
    %c0_74 = arith.constant 0 : index
    %140 = vector.load %arg14[%c0_73, %c0_74] : memref<1x32xf32, #tpu.memory_space<vmem>>, vector<1x32xf32>
    %141 = vector.broadcast %140 : vector<1x32xf32> to vector<8x32xf32>
    %142 = arith.addf %139, %141 : vector<8x32xf32>
    %c0_75 = arith.constant 0 : index
    %c0_76 = arith.constant 0 : index
    %143 = vector.load %arg15[%c0_75, %c0_76] : memref<32x32xf32, #tpu.memory_space<vmem>>, vector<32x32xf32>
    %cst_77 = arith.constant dense<0.000000e+00> : vector<16x32xf32>
    %144 = tpu.matmul %3, %143, %cst_77 {dimension_numbers = #tpu.dot_dimension_numbers<[1], [0], [0], [1], [0, 0, 1, 1], [], []>} : vector<16x32xf32>, vector<32x32xf32>, vector<16x32xf32> -> vector<16x32xf32>
    %c0_78 = arith.constant 0 : index
    %c0_79 = arith.constant 0 : index
    %145 = vector.load %arg16[%c0_78, %c0_79] : memref<1x32xf32, #tpu.memory_space<vmem>>, vector<1x32xf32>
    %146 = vector.broadcast %145 : vector<1x32xf32> to vector<16x32xf32>
    %147 = arith.addf %144, %146 : vector<16x32xf32>
    %c0_80 = arith.constant 0 : index
    %c0_81 = arith.constant 0 : index
    %148 = vector.load %arg17[%c0_80, %c0_81] : memref<32x32xf32, #tpu.memory_space<vmem>>, vector<32x32xf32>
    %cst_82 = arith.constant dense<0.000000e+00> : vector<16x32xf32>
    %149 = tpu.matmul %3, %148, %cst_82 {dimension_numbers = #tpu.dot_dimension_numbers<[1], [0], [0], [1], [0, 0, 1, 1], [], []>} : vector<16x32xf32>, vector<32x32xf32>, vector<16x32xf32> -> vector<16x32xf32>
    %c0_83 = arith.constant 0 : index
    %c0_84 = arith.constant 0 : index
    %150 = vector.load %arg18[%c0_83, %c0_84] : memref<1x32xf32, #tpu.memory_space<vmem>>, vector<1x32xf32>
    %151 = vector.broadcast %150 : vector<1x32xf32> to vector<16x32xf32>
    %152 = arith.addf %149, %151 : vector<16x32xf32>
    %153 = vector.shape_cast %142 : vector<8x32xf32> to vector<1x8x32xf32>
    %154 = vector.shape_cast %147 : vector<16x32xf32> to vector<1x16x32xf32>
    %155 = vector.shape_cast %152 : vector<16x32xf32> to vector<1x16x32xf32>
    %156 = vector.extract_strided_slice %153 {offsets = [0, 0, 0], sizes = [1, 8, 8], strides = [1, 1, 1]} : vector<1x8x32xf32> to vector<1x8x8xf32>
    %157 = vector.extract_strided_slice %154 {offsets = [0, 0, 0], sizes = [1, 16, 8], strides = [1, 1, 1]} : vector<1x16x32xf32> to vector<1x16x8xf32>
    %158 = vector.extract_strided_slice %155 {offsets = [0, 0, 0], sizes = [1, 16, 8], strides = [1, 1, 1]} : vector<1x16x32xf32> to vector<1x16x8xf32>
    "tpu.trace_start"() <{level = 10 : i32, message = "bqe,bke->bqk"}> : () -> ()
    %cst_85 = arith.constant dense<0.000000e+00> : vector<1x8x16xf32>
    %159 = tpu.matmul %156, %157, %cst_85 {dimension_numbers = #tpu.dot_dimension_numbers<[2], [2], [1], [1], [0, 0, 0, 1, 1, 1], [0], [0]>} : vector<1x8x8xf32>, vector<1x16x8xf32>, vector<1x8x16xf32> -> vector<1x8x16xf32>
    "tpu.trace_stop"() : () -> ()
    %cst_86 = arith.constant 0.353553385 : f32
    %160 = vector.broadcast %cst_86 : f32 to vector<1x8x16xf32>
    %161 = arith.mulf %159, %160 : vector<1x8x16xf32>
    %cst_87 = arith.constant dense<0xFF800000> : vector<1x8xf32>
    %162 = vector.multi_reduction <maximumf>, %161, %cst_87 [2] : vector<1x8x16xf32> to vector<1x8xf32>
    %163 = vector.shape_cast %162 : vector<1x8xf32> to vector<1x8x1xf32>
    %164 = vector.broadcast %163 : vector<1x8x1xf32> to vector<1x8x16xf32>
    %165 = arith.subf %161, %164 : vector<1x8x16xf32>
    %166 = math.exp %165 : vector<1x8x16xf32>
    %cst_88 = arith.constant dense<0.000000e+00> : vector<1x8xf32>
    %167 = vector.multi_reduction <add>, %166, %cst_88 [2] : vector<1x8x16xf32> to vector<1x8xf32>
    %168 = vector.shape_cast %167 : vector<1x8xf32> to vector<1x8x1xf32>
    %cst_89 = arith.constant 1.000000e+00 : f32
    %169 = vector.broadcast %cst_89 : f32 to vector<1x8x1xf32>
    %170 = arith.divf %169, %168 : vector<1x8x1xf32>
    %171 = vector.broadcast %170 : vector<1x8x1xf32> to vector<1x8x16xf32>
    %172 = arith.mulf %166, %171 : vector<1x8x16xf32>
    %c0_90 = arith.constant 0 : index
    %c0_91 = arith.constant 0 : index
    %c0_92 = arith.constant 0 : index
    %c0_93 = arith.constant 0 : index
    %173 = vector.load %arg31[%c0_90, %c0_91, %c0_92, %c0_93] : memref<1x4x8x16xf32, #tpu.memory_space<vmem>>, vector<1x1x8x16xf32>
    %174 = vector.shape_cast %173 : vector<1x1x8x16xf32> to vector<1x8x16xf32>
    %175 = vector.shape_cast %172 : vector<1x8x16xf32> to vector<1x1x8x16xf32>
    tpu.vector_store %arg31[%c0_90, %c0_91, %c0_92, %c0_93], %175 {strides = array<i32>} : memref<1x4x8x16xf32, #tpu.memory_space<vmem>>, vector<1x1x8x16xf32>,
    "tpu.trace_start"() <{level = 10 : i32, message = "bqk,bke->bqe"}> : () -> ()
    %cst_94 = arith.constant dense<0.000000e+00> : vector<1x8x8xf32>
    %176 = tpu.matmul %172, %158, %cst_94 {dimension_numbers = #tpu.dot_dimension_numbers<[2], [1], [1], [2], [0, 0, 0, 1, 1, 2], [0], [0]>} : vector<1x8x16xf32>, vector<1x16x8xf32>, vector<1x8x8xf32> -> vector<1x8x8xf32>
    "tpu.trace_stop"() : () -> ()
    %177 = vector.extract_strided_slice %153 {offsets = [0, 0, 8], sizes = [1, 8, 8], strides = [1, 1, 1]} : vector<1x8x32xf32> to vector<1x8x8xf32>
    %178 = vector.extract_strided_slice %154 {offsets = [0, 0, 8], sizes = [1, 16, 8], strides = [1, 1, 1]} : vector<1x16x32xf32> to vector<1x16x8xf32>
    %179 = vector.extract_strided_slice %155 {offsets = [0, 0, 8], sizes = [1, 16, 8], strides = [1, 1, 1]} : vector<1x16x32xf32> to vector<1x16x8xf32>
    "tpu.trace_start"() <{level = 10 : i32, message = "bqe,bke->bqk"}> : () -> ()
    %cst_95 = arith.constant dense<0.000000e+00> : vector<1x8x16xf32>
    %180 = tpu.matmul %177, %178, %cst_95 {dimension_numbers = #tpu.dot_dimension_numbers<[2], [2], [1], [1], [0, 0, 0, 1, 1, 1], [0], [0]>} : vector<1x8x8xf32>, vector<1x16x8xf32>, vector<1x8x16xf32> -> vector<1x8x16xf32>
    "tpu.trace_stop"() : () -> ()
    %cst_96 = arith.constant 0.353553385 : f32
    %181 = vector.broadcast %cst_96 : f32 to vector<1x8x16xf32>
    %182 = arith.mulf %180, %181 : vector<1x8x16xf32>
    %cst_97 = arith.constant dense<0xFF800000> : vector<1x8xf32>
    %183 = vector.multi_reduction <maximumf>, %182, %cst_97 [2] : vector<1x8x16xf32> to vector<1x8xf32>
    %184 = vector.shape_cast %183 : vector<1x8xf32> to vector<1x8x1xf32>
    %185 = vector.broadcast %184 : vector<1x8x1xf32> to vector<1x8x16xf32>
    %186 = arith.subf %182, %185 : vector<1x8x16xf32>
    %187 = math.exp %186 : vector<1x8x16xf32>
    %cst_98 = arith.constant dense<0.000000e+00> : vector<1x8xf32>
    %188 = vector.multi_reduction <add>, %187, %cst_98 [2] : vector<1x8x16xf32> to vector<1x8xf32>
    %189 = vector.shape_cast %188 : vector<1x8xf32> to vector<1x8x1xf32>
    %cst_99 = arith.constant 1.000000e+00 : f32
    %190 = vector.broadcast %cst_99 : f32 to vector<1x8x1xf32>
    %191 = arith.divf %190, %189 : vector<1x8x1xf32>
    %192 = vector.broadcast %191 : vector<1x8x1xf32> to vector<1x8x16xf32>
    %193 = arith.mulf %187, %192 : vector<1x8x16xf32>
    %c0_100 = arith.constant 0 : index
    %c1_101 = arith.constant 1 : index
    %c0_102 = arith.constant 0 : index
    %c0_103 = arith.constant 0 : index
    %194 = vector.load %arg31[%c0_100, %c1_101, %c0_102, %c0_103] : memref<1x4x8x16xf32, #tpu.memory_space<vmem>>, vector<1x1x8x16xf32>
    %195 = vector.shape_cast %194 : vector<1x1x8x16xf32> to vector<1x8x16xf32>
    %196 = vector.shape_cast %193 : vector<1x8x16xf32> to vector<1x1x8x16xf32>
    tpu.vector_store %arg31[%c0_100, %c1_101, %c0_102, %c0_103], %196 {strides = array<i32>} : memref<1x4x8x16xf32, #tpu.memory_space<vmem>>, vector<1x1x8x16xf32>,
    "tpu.trace_start"() <{level = 10 : i32, message = "bqk,bke->bqe"}> : () -> ()
    %cst_104 = arith.constant dense<0.000000e+00> : vector<1x8x8xf32>
    %197 = tpu.matmul %193, %179, %cst_104 {dimension_numbers = #tpu.dot_dimension_numbers<[2], [1], [1], [2], [0, 0, 0, 1, 1, 2], [0], [0]>} : vector<1x8x16xf32>, vector<1x16x8xf32>, vector<1x8x8xf32> -> vector<1x8x8xf32>
    "tpu.trace_stop"() : () -> ()
    %198 = vector.extract_strided_slice %153 {offsets = [0, 0, 16], sizes = [1, 8, 8], strides = [1, 1, 1]} : vector<1x8x32xf32> to vector<1x8x8xf32>
    %199 = vector.extract_strided_slice %154 {offsets = [0, 0, 16], sizes = [1, 16, 8], strides = [1, 1, 1]} : vector<1x16x32xf32> to vector<1x16x8xf32>
    %200 = vector.extract_strided_slice %155 {offsets = [0, 0, 16], sizes = [1, 16, 8], strides = [1, 1, 1]} : vector<1x16x32xf32> to vector<1x16x8xf32>
    "tpu.trace_start"() <{level = 10 : i32, message = "bqe,bke->bqk"}> : () -> ()
    %cst_105 = arith.constant dense<0.000000e+00> : vector<1x8x16xf32>
    %201 = tpu.matmul %198, %199, %cst_105 {dimension_numbers = #tpu.dot_dimension_numbers<[2], [2], [1], [1], [0, 0, 0, 1, 1, 1], [0], [0]>} : vector<1x8x8xf32>, vector<1x16x8xf32>, vector<1x8x16xf32> -> vector<1x8x16xf32>
    "tpu.trace_stop"() : () -> ()
    %cst_106 = arith.constant 0.353553385 : f32
    %202 = vector.broadcast %cst_106 : f32 to vector<1x8x16xf32>
    %203 = arith.mulf %201, %202 : vector<1x8x16xf32>
    %cst_107 = arith.constant dense<0xFF800000> : vector<1x8xf32>
    %204 = vector.multi_reduction <maximumf>, %203, %cst_107 [2] : vector<1x8x16xf32> to vector<1x8xf32>
    %205 = vector.shape_cast %204 : vector<1x8xf32> to vector<1x8x1xf32>
    %206 = vector.broadcast %205 : vector<1x8x1xf32> to vector<1x8x16xf32>
    %207 = arith.subf %203, %206 : vector<1x8x16xf32>
    %208 = math.exp %207 : vector<1x8x16xf32>
    %cst_108 = arith.constant dense<0.000000e+00> : vector<1x8xf32>
    %209 = vector.multi_reduction <add>, %208, %cst_108 [2] : vector<1x8x16xf32> to vector<1x8xf32>
    %210 = vector.shape_cast %209 : vector<1x8xf32> to vector<1x8x1xf32>
    %cst_109 = arith.constant 1.000000e+00 : f32
    %211 = vector.broadcast %cst_109 : f32 to vector<1x8x1xf32>
    %212 = arith.divf %211, %210 : vector<1x8x1xf32>
    %213 = vector.broadcast %212 : vector<1x8x1xf32> to vector<1x8x16xf32>
    %214 = arith.mulf %208, %213 : vector<1x8x16xf32>
    %c0_110 = arith.constant 0 : index
    %c2_111 = arith.constant 2 : index
    %c0_112 = arith.constant 0 : index
    %c0_113 = arith.constant 0 : index
    %215 = vector.load %arg31[%c0_110, %c2_111, %c0_112, %c0_113] : memref<1x4x8x16xf32, #tpu.memory_space<vmem>>, vector<1x1x8x16xf32>
    %216 = vector.shape_cast %215 : vector<1x1x8x16xf32> to vector<1x8x16xf32>
    %217 = vector.shape_cast %214 : vector<1x8x16xf32> to vector<1x1x8x16xf32>
    tpu.vector_store %arg31[%c0_110, %c2_111, %c0_112, %c0_113], %217 {strides = array<i32>} : memref<1x4x8x16xf32, #tpu.memory_space<vmem>>, vector<1x1x8x16xf32>,
    "tpu.trace_start"() <{level = 10 : i32, message = "bqk,bke->bqe"}> : () -> ()
    %cst_114 = arith.constant dense<0.000000e+00> : vector<1x8x8xf32>
    %218 = tpu.matmul %214, %200, %cst_114 {dimension_numbers = #tpu.dot_dimension_numbers<[2], [1], [1], [2], [0, 0, 0, 1, 1, 2], [0], [0]>} : vector<1x8x16xf32>, vector<1x16x8xf32>, vector<1x8x8xf32> -> vector<1x8x8xf32>
    "tpu.trace_stop"() : () -> ()
    %219 = vector.extract_strided_slice %153 {offsets = [0, 0, 24], sizes = [1, 8, 8], strides = [1, 1, 1]} : vector<1x8x32xf32> to vector<1x8x8xf32>
    %220 = vector.extract_strided_slice %154 {offsets = [0, 0, 24], sizes = [1, 16, 8], strides = [1, 1, 1]} : vector<1x16x32xf32> to vector<1x16x8xf32>
    %221 = vector.extract_strided_slice %155 {offsets = [0, 0, 24], sizes = [1, 16, 8], strides = [1, 1, 1]} : vector<1x16x32xf32> to vector<1x16x8xf32>
    "tpu.trace_start"() <{level = 10 : i32, message = "bqe,bke->bqk"}> : () -> ()
    %cst_115 = arith.constant dense<0.000000e+00> : vector<1x8x16xf32>
    %222 = tpu.matmul %219, %220, %cst_115 {dimension_numbers = #tpu.dot_dimension_numbers<[2], [2], [1], [1], [0, 0, 0, 1, 1, 1], [0], [0]>} : vector<1x8x8xf32>, vector<1x16x8xf32>, vector<1x8x16xf32> -> vector<1x8x16xf32>
    "tpu.trace_stop"() : () -> ()
    %cst_116 = arith.constant 0.353553385 : f32
    %223 = vector.broadcast %cst_116 : f32 to vector<1x8x16xf32>
    %224 = arith.mulf %222, %223 : vector<1x8x16xf32>
    %cst_117 = arith.constant dense<0xFF800000> : vector<1x8xf32>
    %225 = vector.multi_reduction <maximumf>, %224, %cst_117 [2] : vector<1x8x16xf32> to vector<1x8xf32>
    %226 = vector.shape_cast %225 : vector<1x8xf32> to vector<1x8x1xf32>
    %227 = vector.broadcast %226 : vector<1x8x1xf32> to vector<1x8x16xf32>
    %228 = arith.subf %224, %227 : vector<1x8x16xf32>
    %229 = math.exp %228 : vector<1x8x16xf32>
    %cst_118 = arith.constant dense<0.000000e+00> : vector<1x8xf32>
    %230 = vector.multi_reduction <add>, %229, %cst_118 [2] : vector<1x8x16xf32> to vector<1x8xf32>
    %231 = vector.shape_cast %230 : vector<1x8xf32> to vector<1x8x1xf32>
    %cst_119 = arith.constant 1.000000e+00 : f32
    %232 = vector.broadcast %cst_119 : f32 to vector<1x8x1xf32>
    %233 = arith.divf %232, %231 : vector<1x8x1xf32>
    %234 = vector.broadcast %233 : vector<1x8x1xf32> to vector<1x8x16xf32>
    %235 = arith.mulf %229, %234 : vector<1x8x16xf32>
    %c0_120 = arith.constant 0 : index
    %c3_121 = arith.constant 3 : index
    %c0_122 = arith.constant 0 : index
    %c0_123 = arith.constant 0 : index
    %236 = vector.load %arg31[%c0_120, %c3_121, %c0_122, %c0_123] : memref<1x4x8x16xf32, #tpu.memory_space<vmem>>, vector<1x1x8x16xf32>
    %237 = vector.shape_cast %236 : vector<1x1x8x16xf32> to vector<1x8x16xf32>
    %238 = vector.shape_cast %235 : vector<1x8x16xf32> to vector<1x1x8x16xf32>
    tpu.vector_store %arg31[%c0_120, %c3_121, %c0_122, %c0_123], %238 {strides = array<i32>} : memref<1x4x8x16xf32, #tpu.memory_space<vmem>>, vector<1x1x8x16xf32>,
    "tpu.trace_start"() <{level = 10 : i32, message = "bqk,bke->bqe"}> : () -> ()
    %cst_124 = arith.constant dense<0.000000e+00> : vector<1x8x8xf32>
    %239 = tpu.matmul %235, %221, %cst_124 {dimension_numbers = #tpu.dot_dimension_numbers<[2], [1], [1], [2], [0, 0, 0, 1, 1, 2], [0], [0]>} : vector<1x8x16xf32>, vector<1x16x8xf32>, vector<1x8x8xf32> -> vector<1x8x8xf32>
    "tpu.trace_stop"() : () -> ()
    %240 = tpu.concatenate %176, %197, %218, %239 in 2 : vector<1x8x8xf32>, vector<1x8x8xf32>, vector<1x8x8xf32>, vector<1x8x8xf32> -> vector<1x8x32xf32>
    %241 = vector.shape_cast %240 : vector<1x8x32xf32> to vector<8x32xf32>
    %c0_125 = arith.constant 0 : index
    %c0_126 = arith.constant 0 : index
    %242 = vector.load %arg19[%c0_125, %c0_126] : memref<32x32xf32, #tpu.memory_space<vmem>>, vector<32x32xf32>
    %cst_127 = arith.constant dense<0.000000e+00> : vector<8x32xf32>
    %243 = tpu.matmul %241, %242, %cst_127 {dimension_numbers = #tpu.dot_dimension_numbers<[1], [0], [0], [1], [0, 0, 1, 1], [], []>} : vector<8x32xf32>, vector<32x32xf32>, vector<8x32xf32> -> vector<8x32xf32>
    %c0_128 = arith.constant 0 : index
    %c0_129 = arith.constant 0 : index
    %244 = vector.load %arg20[%c0_128, %c0_129] : memref<1x32xf32, #tpu.memory_space<vmem>>, vector<1x32xf32>
    %245 = vector.broadcast %244 : vector<1x32xf32> to vector<8x32xf32>
    %246 = arith.addf %243, %245 : vector<8x32xf32>
    %247 = arith.addf %246, %137 : vector<8x32xf32>
    %c0_130 = arith.constant 0 : index
    %c0_131 = arith.constant 0 : index
    %248 = vector.load %arg21[%c0_130, %c0_131] : memref<1x32xf32, #tpu.memory_space<vmem>>, vector<1x32xf32>
    %c0_132 = arith.constant 0 : index
    %c0_133 = arith.constant 0 : index
    %249 = vector.load %arg22[%c0_132, %c0_133] : memref<1x32xf32, #tpu.memory_space<vmem>>, vector<1x32xf32>
    %cst_134 = arith.constant dense<0.000000e+00> : vector<8xf32>
    %250 = vector.multi_reduction <add>, %247, %cst_134 [1] : vector<8x32xf32> to vector<8xf32>
    %251 = vector.shape_cast %250 : vector<8xf32> to vector<8x1xf32>
    %cst_135 = arith.constant 3.200000e+01 : f32
    %252 = vector.broadcast %cst_135 : f32 to vector<8x1xf32>
    %253 = arith.divf %251, %252 : vector<8x1xf32>
    %254 = vector.broadcast %253 : vector<8x1xf32> to vector<8x32xf32>
    %255 = arith.subf %247, %254 : vector<8x32xf32>
    %256 = arith.mulf %255, %255 : vector<8x32xf32>
    %cst_136 = arith.constant dense<0.000000e+00> : vector<8xf32>
    %257 = vector.multi_reduction <add>, %256, %cst_136 [1] : vector<8x32xf32> to vector<8xf32>
    %258 = vector.shape_cast %257 : vector<8xf32> to vector<8x1xf32>
    %cst_137 = arith.constant 3.200000e+01 : f32
    %259 = vector.broadcast %cst_137 : f32 to vector<8x1xf32>
    %260 = arith.divf %258, %259 : vector<8x1xf32>
    %261 = vector.broadcast %253 : vector<8x1xf32> to vector<8x32xf32>
    %262 = arith.subf %247, %261 : vector<8x32xf32>
    %cst_138 = arith.constant 9.99999974E-6 : f32
    %263 = vector.broadcast %cst_138 : f32 to vector<8x1xf32>
    %264 = arith.addf %260, %263 : vector<8x1xf32>
    %265 = math.rsqrt %264 : vector<8x1xf32>
    %266 = vector.broadcast %265 : vector<8x1xf32> to vector<8x32xf32>
    %267 = arith.mulf %262, %266 : vector<8x32xf32>
    %268 = vector.broadcast %248 : vector<1x32xf32> to vector<8x32xf32>
    %269 = arith.mulf %267, %268 : vector<8x32xf32>
    %270 = vector.broadcast %249 : vector<1x32xf32> to vector<8x32xf32>
    %271 = arith.addf %269, %270 : vector<8x32xf32>
    %c0_139 = arith.constant 0 : index
    %c0_140 = arith.constant 0 : index
    %272 = vector.load %arg23[%c0_139, %c0_140] : memref<32x64xf32, #tpu.memory_space<vmem>>, vector<32x64xf32>
    %cst_141 = arith.constant dense<0.000000e+00> : vector<8x64xf32>
    %273 = tpu.matmul %271, %272, %cst_141 {dimension_numbers = #tpu.dot_dimension_numbers<[1], [0], [0], [1], [0, 0, 1, 1], [], []>} : vector<8x32xf32>, vector<32x64xf32>, vector<8x64xf32> -> vector<8x64xf32>
    %c0_142 = arith.constant 0 : index
    %c0_143 = arith.constant 0 : index
    %274 = vector.load %arg24[%c0_142, %c0_143] : memref<1x64xf32, #tpu.memory_space<vmem>>, vector<1x64xf32>
    %275 = vector.broadcast %274 : vector<1x64xf32> to vector<8x64xf32>
    %276 = arith.addf %273, %275 : vector<8x64xf32>
    %cst_144 = arith.constant 0.000000e+00 : f32
    %277 = vector.broadcast %cst_144 : f32 to vector<8x64xf32>
    %278 = arith.maximumf %276, %277 : vector<8x64xf32>
    %c0_145 = arith.constant 0 : index
    %c0_146 = arith.constant 0 : index
    %279 = vector.load %arg25[%c0_145, %c0_146] : memref<64x32xf32, #tpu.memory_space<vmem>>, vector<64x32xf32>
    %cst_147 = arith.constant dense<0.000000e+00> : vector<8x32xf32>
    %280 = tpu.matmul %278, %279, %cst_147 {dimension_numbers = #tpu.dot_dimension_numbers<[1], [0], [0], [1], [0, 0, 1, 1], [], []>} : vector<8x64xf32>, vector<64x32xf32>, vector<8x32xf32> -> vector<8x32xf32>
    %c0_148 = arith.constant 0 : index
    %c0_149 = arith.constant 0 : index
    %281 = vector.load %arg26[%c0_148, %c0_149] : memref<1x32xf32, #tpu.memory_space<vmem>>, vector<1x32xf32>
    %282 = vector.broadcast %281 : vector<1x32xf32> to vector<8x32xf32>
    %283 = arith.addf %280, %282 : vector<8x32xf32>
    %284 = arith.addf %283, %271 : vector<8x32xf32>
    %c0_150 = arith.constant 0 : index
    %c0_151 = arith.constant 0 : index
    %285 = vector.load %arg27[%c0_150, %c0_151] : memref<1x32xf32, #tpu.memory_space<vmem>>, vector<1x32xf32>
    %c0_152 = arith.constant 0 : index
    %c0_153 = arith.constant 0 : index
    %286 = vector.load %arg28[%c0_152, %c0_153] : memref<1x32xf32, #tpu.memory_space<vmem>>, vector<1x32xf32>
    %cst_154 = arith.constant dense<0.000000e+00> : vector<8xf32>
    %287 = vector.multi_reduction <add>, %284, %cst_154 [1] : vector<8x32xf32> to vector<8xf32>
    %288 = vector.shape_cast %287 : vector<8xf32> to vector<8x1xf32>
    %cst_155 = arith.constant 3.200000e+01 : f32
    %289 = vector.broadcast %cst_155 : f32 to vector<8x1xf32>
    %290 = arith.divf %288, %289 : vector<8x1xf32>
    %291 = vector.broadcast %290 : vector<8x1xf32> to vector<8x32xf32>
    %292 = arith.subf %284, %291 : vector<8x32xf32>
    %293 = arith.mulf %292, %292 : vector<8x32xf32>
    %cst_156 = arith.constant dense<0.000000e+00> : vector<8xf32>
    %294 = vector.multi_reduction <add>, %293, %cst_156 [1] : vector<8x32xf32> to vector<8xf32>
    %295 = vector.shape_cast %294 : vector<8xf32> to vector<8x1xf32>
    %cst_157 = arith.constant 3.200000e+01 : f32
    %296 = vector.broadcast %cst_157 : f32 to vector<8x1xf32>
    %297 = arith.divf %295, %296 : vector<8x1xf32>
    %298 = vector.broadcast %290 : vector<8x1xf32> to vector<8x32xf32>
    %299 = arith.subf %284, %298 : vector<8x32xf32>
    %cst_158 = arith.constant 9.99999974E-6 : f32
    %300 = vector.broadcast %cst_158 : f32 to vector<8x1xf32>
    %301 = arith.addf %297, %300 : vector<8x1xf32>
    %302 = math.rsqrt %301 : vector<8x1xf32>
    %303 = vector.broadcast %302 : vector<8x1xf32> to vector<8x32xf32>
    %304 = arith.mulf %299, %303 : vector<8x32xf32>
    %305 = vector.broadcast %285 : vector<1x32xf32> to vector<8x32xf32>
    %306 = arith.mulf %304, %305 : vector<8x32xf32>
    %307 = vector.broadcast %286 : vector<1x32xf32> to vector<8x32xf32>
    %308 = arith.addf %306, %307 : vector<8x32xf32>
    %309 = vector.shape_cast %308 : vector<8x32xf32> to vector<1x8x32xf32>
    %c0_159 = arith.constant 0 : index
    %c0_160 = arith.constant 0 : index
    %c0_161 = arith.constant 0 : index
    %310 = vector.load %arg29[%c0_159, %c0_160, %c0_161] : memref<1x8x32xf32, #tpu.memory_space<vmem>>, vector<1x8x32xf32>
    tpu.vector_store %arg29[%c0_159, %c0_160, %c0_161], %309 {strides = array<i32>} : memref<1x8x32xf32, #tpu.memory_space<vmem>>, vector<1x8x32xf32>,
    return
  }
  func.func @transform_0(%arg0: i32) -> (i32, i32, i32) {
    %c0_i32 = arith.constant 0 : i32
    %c0_i32_0 = arith.constant 0 : i32
    %c0_i32_1 = arith.constant 0 : i32
    return %arg0, %c0_i32, %c0_i32_0 : i32, i32, i32
  }
  func.func @transform_1(%arg0: i32) -> (i32, i32, i32) {
    %c0_i32 = arith.constant 0 : i32
    %c0_i32_0 = arith.constant 0 : i32
    %c0_i32_1 = arith.constant 0 : i32
    return %arg0, %c0_i32, %c0_i32_0 : i32, i32, i32
  }
  func.func @transform_2(%arg0: i32) -> (i32, i32) {
    %c0_i32 = arith.constant 0 : i32
    %c0_i32_0 = arith.constant 0 : i32
    %c0_i32_1 = arith.constant 0 : i32
    return %c0_i32, %c0_i32_0 : i32, i32
  }
  func.func @transform_3(%arg0: i32) -> (i32, i32) {
    %c0_i32 = arith.constant 0 : i32
    %c0_i32_0 = arith.constant 0 : i32
    %c0_i32_1 = arith.constant 0 : i32
    return %c0_i32, %c0_i32_0 : i32, i32
  }
  func.func @transform_4(%arg0: i32) -> (i32, i32) {
    %c0_i32 = arith.constant 0 : i32
    %c0_i32_0 = arith.constant 0 : i32
    %c0_i32_1 = arith.constant 0 : i32
    return %c0_i32, %c0_i32_0 : i32, i32
  }
  func.func @transform_5(%arg0: i32) -> (i32, i32) {
    %c0_i32 = arith.constant 0 : i32
    %c0_i32_0 = arith.constant 0 : i32
    %c0_i32_1 = arith.constant 0 : i32
    return %c0_i32, %c0_i32_0 : i32, i32
  }
  func.func @transform_6(%arg0: i32) -> (i32, i32) {
    %c0_i32 = arith.constant 0 : i32
    %c0_i32_0 = arith.constant 0 : i32
    %c0_i32_1 = arith.constant 0 : i32
    return %c0_i32, %c0_i32_0 : i32, i32
  }
  func.func @transform_7(%arg0: i32) -> (i32, i32) {
    %c0_i32 = arith.constant 0 : i32
    %c0_i32_0 = arith.constant 0 : i32
    %c0_i32_1 = arith.constant 0 : i32
    return %c0_i32, %c0_i32_0 : i32, i32
  }
  func.func @transform_8(%arg0: i32) -> (i32, i32) {
    %c0_i32 = arith.constant 0 : i32
    %c0_i32_0 = arith.constant 0 : i32
    %c0_i32_1 = arith.constant 0 : i32
    return %c0_i32, %c0_i32_0 : i32, i32
  }
  func.func @transform_9(%arg0: i32) -> (i32, i32) {
    %c0_i32 = arith.constant 0 : i32
    %c0_i32_0 = arith.constant 0 : i32
    %c0_i32_1 = arith.constant 0 : i32
    return %c0_i32, %c0_i32_0 : i32, i32
  }
  func.func @transform_10(%arg0: i32) -> (i32, i32) {
    %c0_i32 = arith.constant 0 : i32
    %c0_i32_0 = arith.constant 0 : i32
    %c0_i32_1 = arith.constant 0 : i32
    return %c0_i32, %c0_i32_0 : i32, i32
  }
  func.func @transform_11(%arg0: i32) -> (i32, i32) {
    %c0_i32 = arith.constant 0 : i32
    %c0_i32_0 = arith.constant 0 : i32
    %c0_i32_1 = arith.constant 0 : i32
    return %c0_i32, %c0_i32_0 : i32, i32
  }
  func.func @transform_12(%arg0: i32) -> (i32, i32) {
    %c0_i32 = arith.constant 0 : i32
    %c0_i32_0 = arith.constant 0 : i32
    %c0_i32_1 = arith.constant 0 : i32
    return %c0_i32, %c0_i32_0 : i32, i32
  }
  func.func @transform_13(%arg0: i32) -> (i32, i32) {
    %c0_i32 = arith.constant 0 : i32
    %c0_i32_0 = arith.constant 0 : i32
    %c0_i32_1 = arith.constant 0 : i32
    return %c0_i32, %c0_i32_0 : i32, i32
  }
  func.func @transform_14(%arg0: i32) -> (i32, i32) {
    %c0_i32 = arith.constant 0 : i32
    %c0_i32_0 = arith.constant 0 : i32
    %c0_i32_1 = arith.constant 0 : i32
    return %c0_i32, %c0_i32_0 : i32, i32
  }
  func.func @transform_15(%arg0: i32) -> (i32, i32) {
    %c0_i32 = arith.constant 0 : i32
    %c0_i32_0 = arith.constant 0 : i32
    %c0_i32_1 = arith.constant 0 : i32
    return %c0_i32, %c0_i32_0 : i32, i32
  }
  func.func @transform_16(%arg0: i32) -> (i32, i32) {
    %c0_i32 = arith.constant 0 : i32
    %c0_i32_0 = arith.constant 0 : i32
    %c0_i32_1 = arith.constant 0 : i32
    return %c0_i32, %c0_i32_0 : i32, i32
  }
  func.func @transform_17(%arg0: i32) -> (i32, i32) {
    %c0_i32 = arith.constant 0 : i32
    %c0_i32_0 = arith.constant 0 : i32
    %c0_i32_1 = arith.constant 0 : i32
    return %c0_i32, %c0_i32_0 : i32, i32
  }
  func.func @transform_18(%arg0: i32) -> (i32, i32) {
    %c0_i32 = arith.constant 0 : i32
    %c0_i32_0 = arith.constant 0 : i32
    %c0_i32_1 = arith.constant 0 : i32
    return %c0_i32, %c0_i32_0 : i32, i32
  }
  func.func @transform_19(%arg0: i32) -> (i32, i32) {
    %c0_i32 = arith.constant 0 : i32
    %c0_i32_0 = arith.constant 0 : i32
    %c0_i32_1 = arith.constant 0 : i32
    return %c0_i32, %c0_i32_0 : i32, i32
  }
  func.func @transform_20(%arg0: i32) -> (i32, i32) {
    %c0_i32 = arith.constant 0 : i32
    %c0_i32_0 = arith.constant 0 : i32
    %c0_i32_1 = arith.constant 0 : i32
    return %c0_i32, %c0_i32_0 : i32, i32
  }
  func.func @transform_21(%arg0: i32) -> (i32, i32) {
    %c0_i32 = arith.constant 0 : i32
    %c0_i32_0 = arith.constant 0 : i32
    %c0_i32_1 = arith.constant 0 : i32
    return %c0_i32, %c0_i32_0 : i32, i32
  }
  func.func @transform_22(%arg0: i32) -> (i32, i32) {
    %c0_i32 = arith.constant 0 : i32
    %c0_i32_0 = arith.constant 0 : i32
    %c0_i32_1 = arith.constant 0 : i32
    return %c0_i32, %c0_i32_0 : i32, i32
  }
  func.func @transform_23(%arg0: i32) -> (i32, i32) {
    %c0_i32 = arith.constant 0 : i32
    %c0_i32_0 = arith.constant 0 : i32
    %c0_i32_1 = arith.constant 0 : i32
    return %c0_i32, %c0_i32_0 : i32, i32
  }
  func.func @transform_24(%arg0: i32) -> (i32, i32) {
    %c0_i32 = arith.constant 0 : i32
    %c0_i32_0 = arith.constant 0 : i32
    %c0_i32_1 = arith.constant 0 : i32
    return %c0_i32, %c0_i32_0 : i32, i32
  }
  func.func @transform_25(%arg0: i32) -> (i32, i32) {
    %c0_i32 = arith.constant 0 : i32
    %c0_i32_0 = arith.constant 0 : i32
    %c0_i32_1 = arith.constant 0 : i32
    return %c0_i32, %c0_i32_0 : i32, i32
  }
  func.func @transform_26(%arg0: i32) -> (i32, i32) {
    %c0_i32 = arith.constant 0 : i32
    %c0_i32_0 = arith.constant 0 : i32
    %c0_i32_1 = arith.constant 0 : i32
    return %c0_i32, %c0_i32_0 : i32, i32
  }
  func.func @transform_27(%arg0: i32) -> (i32, i32) {
    %c0_i32 = arith.constant 0 : i32
    %c0_i32_0 = arith.constant 0 : i32
    %c0_i32_1 = arith.constant 0 : i32
    return %c0_i32, %c0_i32_0 : i32, i32
  }
  func.func @transform_28(%arg0: i32) -> (i32, i32, i32) {
    %c0_i32 = arith.constant 0 : i32
    %c0_i32_0 = arith.constant 0 : i32
    %c0_i32_1 = arith.constant 0 : i32
    return %arg0, %c0_i32, %c0_i32_0 : i32, i32, i32
  }
  func.func @transform_29(%arg0: i32) -> (i32, i32, i32, i32) {
    %c0_i32 = arith.constant 0 : i32
    %c0_i32_0 = arith.constant 0 : i32
    %c0_i32_1 = arith.constant 0 : i32
    %c0_i32_2 = arith.constant 0 : i32
    return %arg0, %c0_i32, %c0_i32_0, %c0_i32_1 : i32, i32, i32, i32
  }
  func.func @transform_30(%arg0: i32) -> (i32, i32, i32, i32) {
    %c0_i32 = arith.constant 0 : i32
    %c0_i32_0 = arith.constant 0 : i32
    %c0_i32_1 = arith.constant 0 : i32
    %c0_i32_2 = arith.constant 0 : i32
    return %arg0, %c0_i32, %c0_i32_0, %c0_i32_1 : i32, i32, i32, i32
  }
}

</mosaic_0001>

<bundles_post_ra>
// kernel: tpu_custom_call.1
= control target key start
LH: loop header
LB: loop body
LE: loop exit
PB: predicated region body
PF: predicated region fallthrough
CT: control target
= control target key end

     0   :  { %s3242_s6 = smov 1   ;;  %s3243_s10 = smov 2   ;;  %s3930_s0 = inlined_call_operand.smem [shape: u32[31], index: -1, kind: input, shape index: {}] }
   0x1   :  { %s3297_s5 = sld [smem:[%s3930_s0]]   ;;  %s3244_s14 = smov 3  }
   0x2   :  { %s3302_s9 = sld [smem:[%s3930_s0 + %s3242_s6]]   ;;  %s3245_s18 = smov 4  }
   0x3   :  { %s3307_s13 = sld [smem:[%s3930_s0 + %s3243_s10]]   ;;  %s3246_s22 = smov 5  }
   0x4   :  { %s3312_s17 = sld [smem:[%s3930_s0 + %s3244_s14]]   ;;  %s3247_s26 = smov 6  }
   0x5   :  { %s3317_s21 = sld [smem:[%s3930_s0 + %s3245_s18]]   ;;  %s3248_s30 = smov 7  }
   0x6   :  { %s3322_s25 = sld [smem:[%s3930_s0 + %s3246_s22]]   ;;  %s3249_s4 = smov 8  }
   0x7   :  { %3947 = sst [smem:[#allocation27_spill]] %s3297_s5  ;;  %s3250_s10 = smov 9  }
   0x8   :  { %3948 = sst [smem:[#allocation28_spill]] %s3302_s9  ;;  %s3251_s15 = smov 10  }
   0x9   :  { %3949 = sst [smem:[#allocation29_spill]] %s3307_s13  ;;  %s3252_s20 = smov 11  }
   0xa   :  { %3950 = sst [smem:[#allocation30_spill]] %s3312_s17  ;;  %s3254_s1 = smov 13  }
   0xb   :  { %s3327_s29 = sld [smem:[%s3930_s0 + %s3247_s26]]   ;;  %s3253_s26 = smov 12  }
   0xc   :  { %s3332_s3 = sld [smem:[%s3930_s0 + %s3248_s30]]   ;;  %s3255_s7 = smov 14  }
   0xd   :  { %s3337_s8 = sld [smem:[%s3930_s0 + %s3249_s4]]   ;;  %s3257_s22 = smov 16  }
   0xe   :  { %s3342_s14 = sld [smem:[%s3930_s0 + %s3250_s10]]   ;;  %s3258_s28 = smov 17  }
   0xf   :  { %s3347_s19 = sld [smem:[%s3930_s0 + %s3251_s15]]   ;;  %s3256_s15 = smov 15  }
  0x10   :  { %s3352_s24 = sld [smem:[%s3930_s0 + %s3252_s20]]  }
  0x11   :  { %3951 = sst [smem:[#allocation31_spill]] %s3327_s29 }
  0x12   :  { %3952 = sst [smem:[#allocation32_spill]] %s3332_s3 }
  0x13   :  { %3953 = sst [smem:[#allocation33_spill]] %s3337_s8 }
  0x14   :  { %3954 = sst [smem:[#allocation34_spill]] %s3342_s14 }
  0x15   :  { %3955 = sst [smem:[#allocation35_spill]] %s3347_s19 }
  0x16   :  { %3956 = sst [smem:[#allocation36_spill]] %s3352_s24 }
  0x17   :  { %s3357_s30 = sld [smem:[%s3930_s0 + %s3253_s26]]  }
  0x18   :  { %s3362_s6 = sld [smem:[%s3930_s0 + %s3254_s1]]  }
  0x19   :  { %s3367_s12 = sld [smem:[%s3930_s0 + %s3255_s7]]   ;;  %s3259_s7 = smov 18  }
  0x1a   :  { %s3372_s20 = sld [smem:[%s3930_s0 + %s3256_s15]]   ;;  %s3260_s15 = smov 19  }
  0x1b   :  { %s3377_s27 = sld [smem:[%s3930_s0 + %s3257_s22]]   ;;  %s3261_s22 = smov 20  }
  0x1c   :  { %s3382_s4 = sld [smem:[%s3930_s0 + %s3258_s28]]   ;;  %s3262_s28 = smov 21  }
  0x1d   :  { %s3392_s24 = sld [smem:[%s3930_s0 + %s3260_s15]]   ;;  %s3264_s15 = smov 23  }
  0x1e   :  { %3957 = sst [smem:[#allocation37_spill]] %s3362_s6 }
  0x1f   :  { %3958 = sst [smem:[#allocation38_spill]] %s3367_s12 }
  0x20   :  { %3959 = sst [smem:[#allocation39_spill]] %s3372_s20 }
  0x21   :  { %s3387_s6 = sld [smem:[%s3930_s0 + %s3259_s7]]   ;;  %s3263_s7 = smov 22  }
  0x22   :  { %3960 = sst [smem:[#allocation40_spill]] %s3382_s4 }
  0x23   :  { %3962 = sst [smem:[#allocation42_spill]] %s3392_s24 }
  0x24   :  { %s3397_s19 = sld [smem:[%s3930_s0 + %s3261_s22]]   ;;  %s3265_s22 = smov 24  }
  0x25   :  { %s3402_s4 = sld [smem:[%s3930_s0 + %s3262_s28]]   ;;  %s3266_s28 = smov 25  }
  0x26   :  { %s3407_s20 = sld [smem:[%s3930_s0 + %s3263_s7]]   ;;  %s3267_s7 = smov 26  }
  0x27   :  { %3961 = sst [smem:[#allocation41_spill]] %s3387_s6 }
  0x28   :  { %s3412_s24 = sld [smem:[%s3930_s0 + %s3264_s15]]   ;;  %s3268_s15 = smov 27  }
  0x29   :  { %s3427_s9 = sld [smem:[%s3930_s0 + %s3267_s7]]   ;;  %s3271_s7 = smov 30  }
  0x2a   :  { %3963 = sst [smem:[#allocation43_spill]] %s3397_s19 }
  0x2b   :  { %3964 = sst [smem:[#allocation44_spill]] %s3402_s4 }
  0x2c   :  { %s3417_s19 = sld [smem:[%s3930_s0 + %s3265_s22]]   ;;  %s3269_s22 = smov 28  }
  0x2d   :  { %s3422_s4 = sld [smem:[%s3930_s0 + %s3266_s28]]   ;;  %s3270_s28 = smov 29  }
  0x2e   :  { %3965 = sst [smem:[#allocation45_spill]] %s3412_s24 }
  0x2f   :  { %3968 = sst [smem:[#allocation48_spill]] %s3427_s9 }
  0x30   :  { %s3432_s24 = sld [smem:[%s3930_s0 + %s3268_s15]]  }
  0x31   :  { %s3447_s9 = sld [smem:[%s3930_s0 + %s3271_s7]]  }
  0x32   :  { %3966 = sst [smem:[#allocation46_spill]] %s3417_s19 }
  0x33   :  { %3967 = sst [smem:[#allocation47_spill]] %s3422_s4 }
  0x34   :  { %s3437_s19 = sld [smem:[%s3930_s0 + %s3269_s22]]  }
  0x35   :  { %s3442_s4 = sld [smem:[%s3930_s0 + %s3270_s28]]  }
  0x36   :  { %3969 = sst [smem:[#allocation49_spill]] %s3432_s24 }
  0x37   :  { %3972 = sst [smem:[#allocation52_spill]] %s3447_s9 }
  0x3a   :  { %3970 = sst [smem:[#allocation50_spill]] %s3437_s19 }
  0x3b   :  { %3971 = sst [smem:[#allocation51_spill]] %s3442_s4 }
  0x3c   :  { %67 = vsyncpa [#allocation3], 0 }
  0x3d   :  { %69 = vsyncpa [#allocation3 + $0x1], 0 }
  0x3e   :  { %70 = vsyncpa [#allocation6], 0 }
  0x3f   :  { %71 = vsyncpa [#allocation9], 0 }
  0x40   :  { %72 = vsyncpa [#allocation12], 0 }
  0x41   :  { %73 = vsyncpa [#allocation15], 0 }
  0x42   :  { %74 = vsyncpa [#allocation4], 0 }
  0x43   :  { %76 = vsyncpa [#allocation4 + $0x1], 0 }
  0x44   :  { %77 = vsyncpa [#allocation18], 0 }
  0x45   :  { %79 = vsyncpa [#allocation18 + $0x1], 0  ;;  %s3449_s15 = smov 0   ;;  %s3451_s16 = smov 0  }
  0x46   :  { %s3453_s18 = smov 0   ;;  %s3455_s22 = smov 0  }
  0x47 LB: > { %s3973_s13 = sld [smem:[#allocation29_spill]]  ;;  %s3473_s23 = sadd.s32 4294967295, %s3240_s22   ;;  %s3232_s16 = sphi %s3451_s16, %s4021_s16   ;;  %s3228_s15 = sphi %s3449_s15, %s4020_s15   ;;  %s3240_s22 = sphi %s3455_s22, %s4023_s22   ;;  %s3236_s18 = sphi %s3453_s18, %s4022_s18  }
  0x48   : > { %s3974_s5 = sld [smem:[#allocation27_spill]]  ;;  %p2536_p0 = scmp.ge.s32.totalorder %s3240_s22, 1 }
  0x49   : > { %s3975_s12 = sld [smem:[#allocation38_spill]]  ;;  %p3940_p1 = scmp.eq.s32.totalorder %s3473_s23, 0 }
  0x4a   : > { %s3976_s8 = sld [smem:[#allocation33_spill]]  ;;  %p766_p2 = scmp.lt.s32.totalorder %s3240_s22, 3 }
  0x4b   : > { %s3977_s6 = sld [smem:[#allocation41_spill]]  ;;  %s3272_s28 = smov [#allocation5]  }
  0x4c   : > { %s3978_s29 = sld [smem:[#allocation31_spill]]  ;;  %p3478_p3 = pnand %p2536_p0, %p766_p2 }
  0x4d   : > { %s3482_s1 = sshll.u32 %s3272_s28, 4  ;;  %s829_s2 = sshll.u32 %s3357_s30, 4  ;;  %s792_s1 = int_to_ptr.vmem [resolvable:$true] %s3482_s1  ;;  %s3495_s2 = int_to_ptr.hbm [resolvable:$true] %s829_s2 }
  0x4e   : > { %p2656_p4 = pneg %p3478_p3  ;;  %s863_s10 = sshll.u32 %s3377_s27, 4  ;;  %s3518_s10 = int_to_ptr.hbm [resolvable:$true] %s863_s10 }
  0x4f   : > { %s3273_s11 = smov [#allocation8]  }
  0x50   : > { %p3491_p6 = pnand %p2656_p4, %p3940_p1  ;;  %s3498_s28 = sshll.u32 %s3273_s11, 4  ;;  %s832_s28 = int_to_ptr.vmem [resolvable:$true] %s3498_s28 }
  0x52   : > { %s789_s0 = sshll.u32 %s3978_s29, 4  ;;  %p3503_p8 = pneg %p3491_p6  ;;  %s3470_s0 = int_to_ptr.hbm [resolvable:$true] %s789_s0 }
  0x53   : > { %s2858_s24 = sshra.s32 %s3470_s0, 4  ;;  %s2865_s4 = scalar_lea.hbm %s3978_s29, 32  ;;  %s2859_s24 = int_to_ptr.hbm [resolvable:$true] %s2858_s24 }
  0x54   : > { %s2860_s19 = scalar_lea.hbm %s2859_s24, 32  ;;  %p2866_p11 = scmp.lt.s32.totalorder %s2859_s24, %s3978_s29 }
  0x55   : > { %p2861_p7 = scmp.ne.s32.totalorder %s2859_s24, %s2860_s19  ;;  %p2867_p12 = scmp.lt.s32.totalorder %s2865_s4, %s2860_s19 }
  0x57   : > { %p2863_p9 = pnand %p3503_p8, %p2861_p7  ;;  %p2868_p13 = por %p2867_p12, %p2866_p11 }
  0x59   : > { %p2864_p10 = pneg %p2863_p9 }
  0x5b   : > { %p2869_p0 = pnand %p2868_p13, %p2864_p10 }
  0x5d   : > { %2872 = shalt.err (!%p2869_p0)
}
  0x5e   : > { %s3274_s11 = smov 128   ;;  %s3275_s14 = smov 8  }
  0x5f   : > { %2659 = dma.hbm_to_vmem [thread:$0]  (!%p3491_p6), %s3470_s0, 512, %s792_s1, [#allocation6], %s3274_s11, %s3274_s11, %s3275_s14  }
  0x60   : > { %s2888_s19 = sshra.s32 %s3495_s2, 4  ;;  %s2895_s4 = scalar_lea.hbm %s3357_s30, 32  ;;  %s2889_s19 = int_to_ptr.hbm [resolvable:$true] %s2888_s19 }
  0x61   : > { %s2890_s24 = scalar_lea.hbm %s2889_s19, 32  ;;  %p2896_p9 = scmp.lt.s32.totalorder %s2889_s19, %s3357_s30 }
  0x62   : > { %p2891_p2 = scmp.ne.s32.totalorder %s2889_s19, %s2890_s24  ;;  %p2897_p10 = scmp.lt.s32.totalorder %s2895_s4, %s2890_s24 }
  0x64   : > { %p2893_p4 = pnand %p2891_p2, %p3503_p8  ;;  %p2898_p11 = por %p2897_p10, %p2896_p9 }
  0x66   : > { %p2894_p7 = pneg %p2893_p4 }
  0x68   : > { %p2899_p12 = pnand %p2898_p11, %p2894_p7 }
  0x6a   : > { %2902 = shalt.err (!%p2899_p12)
}
  0x6b   : > { %2665 = dma.hbm_to_vmem [thread:$0]  (!%p3491_p6), %s3495_s2, 512, %s832_s28, [#allocation9], %s3274_s11, %s3274_s11, %s3275_s14  }
  0x6c   : > { %s806_s0 = sshll.u32 %s3976_s8, 4  ;;  %s3276_s1 = smov [#allocation11]   ;;  %s3532_s0 = int_to_ptr.hbm [resolvable:$true] %s806_s0 }
  0x6d   : > { %s865_s29 = sshll.u32 %s3276_s1, 4  ;;  %s2918_s19 = sshra.s32 %s3518_s10, 4  ;;  %s866_s29 = int_to_ptr.vmem [resolvable:$true] %s865_s29  ;;  %s2919_s19 = int_to_ptr.hbm [resolvable:$true] %s2918_s19 }
  0x6e   : > { %s2920_s24 = scalar_lea.hbm %s2919_s19, 32  ;;  %s2925_s4 = scalar_lea.hbm %s3377_s27, 32 }
  0x6f   : > { %p2921_p13 = scmp.ne.s32.totalorder %s2919_s19, %s2920_s24  ;;  %p2926_p4 = scmp.lt.s32.totalorder %s2919_s19, %s3377_s27 }
  0x70   : > { %p2927_p7 = scmp.lt.s32.totalorder %s2925_s4, %s2920_s24 }
  0x71   : > { %p2923_p0 = pnand %p2921_p13, %p3503_p8 }
  0x72   : > { %p2928_p9 = por %p2927_p7, %p2926_p4 }
  0x73   : > { %p2924_p2 = pneg %p2923_p0 }
  0x75   : > { %p2929_p10 = pnand %p2928_p9, %p2924_p2 }
  0x77   : > { %2932 = shalt.err (!%p2929_p10)
}
  0x78   : > { %2671 = dma.hbm_to_vmem [thread:$0]  (!%p3491_p6), %s3518_s10, 512, %s866_s29, [#allocation12], %s3274_s11, %s3274_s11, %s3275_s14  }
  0x79   : > { %s3277_s2 = smov [#allocation7]   ;;  %s846_s1 = sshll.u32 %s3975_s12, 4  ;;  %s3546_s1 = int_to_ptr.hbm [resolvable:$true] %s846_s1 }
  0x7a   : > { %s808_s28 = sshll.u32 %s3277_s2, 4  ;;  %s2948_s19 = sshra.s32 %s3532_s0, 4  ;;  %s809_s28 = int_to_ptr.vmem [resolvable:$true] %s808_s28  ;;  %s2949_s19 = int_to_ptr.hbm [resolvable:$true] %s2948_s19 }
  0x7b   : > { %s2950_s24 = scalar_lea.hbm %s2949_s19, 32  ;;  %s2955_s4 = scalar_lea.hbm %s3976_s8, 32 }
  0x7c   : > { %p2951_p11 = scmp.ne.s32.totalorder %s2949_s19, %s2950_s24  ;;  %p2956_p0 = scmp.lt.s32.totalorder %s2949_s19, %s3976_s8 }
  0x7d   : > { %p2957_p2 = scmp.lt.s32.totalorder %s2955_s4, %s2950_s24 }
  0x7e   : > { %p2953_p12 = pnand %p2951_p11, %p3503_p8 }
  0x7f   : > { %p2958_p4 = por %p2957_p2, %p2956_p0 }
  0x80   : > { %p2954_p13 = pneg %p2953_p12 }
  0x82   : > { %p2959_p7 = pnand %p2958_p4, %p2954_p13 }
  0x84   : > { %2962 = shalt.err (!%p2959_p7)
}
  0x85   : > { %2662 = dma.hbm_to_vmem [thread:$0]  (!%p3491_p6), %s3532_s0, 512, %s809_s28, [#allocation6], %s3274_s11, %s3274_s11, %s3275_s14  }
  0x86   : > { %s880_s29 = sshll.u32 %s3977_s6, 4  ;;  %s3278_s10 = smov [#allocation10]   ;;  %s3560_s29 = int_to_ptr.hbm [resolvable:$true] %s880_s29 }
  0x87   : > { %s848_s2 = sshll.u32 %s3278_s10, 4  ;;  %s2978_s19 = sshra.s32 %s3546_s1, 4  ;;  %s849_s2 = int_to_ptr.vmem [resolvable:$true] %s848_s2  ;;  %s2979_s19 = int_to_ptr.hbm [resolvable:$true] %s2978_s19 }
  0x88   : > { %s2980_s24 = scalar_lea.hbm %s2979_s19, 32  ;;  %s2985_s4 = scalar_lea.hbm %s3975_s12, 32 }
  0x89   : > { %p2981_p9 = scmp.ne.s32.totalorder %s2979_s19, %s2980_s24  ;;  %p2986_p12 = scmp.lt.s32.totalorder %s2979_s19, %s3975_s12 }
  0x8a   : > { %p2987_p13 = scmp.lt.s32.totalorder %s2985_s4, %s2980_s24 }
  0x8b   : > { %p2983_p10 = pnand %p2981_p9, %p3503_p8 }
  0x8c   : > { %p2988_p0 = por %p2987_p13, %p2986_p12 }
  0x8d   : > { %p2984_p11 = pneg %p2983_p10 }
  0x8f   : > { %p2989_p2 = pnand %p2988_p0, %p2984_p11 }
  0x91   : > { %2992 = shalt.err (!%p2989_p2)
}
  0x92   : > { %2668 = dma.hbm_to_vmem [thread:$0]  (!%p3491_p6), %s3546_s1, 512, %s849_s2, [#allocation9], %s3274_s11, %s3274_s11, %s3275_s14  }
  0x93   : > { %s3279_s0 = smov [#allocation13]   ;;  %s903_s10 = sshll.u32 %s3407_s20, 4  ;;  %s3574_s10 = int_to_ptr.hbm [resolvable:$true] %s903_s10 }
  0x94   : > { %s882_s28 = sshll.u32 %s3279_s0, 4  ;;  %s3008_s19 = sshra.s32 %s3560_s29, 4  ;;  %s883_s28 = int_to_ptr.vmem [resolvable:$true] %s882_s28  ;;  %s3009_s19 = int_to_ptr.hbm [resolvable:$true] %s3008_s19 }
  0x95   : > { %s3010_s24 = scalar_lea.hbm %s3009_s19, 32  ;;  %s3015_s4 = scalar_lea.hbm %s3977_s6, 32 }
  0x96   : > { %p3011_p4 = scmp.ne.s32.totalorder %s3009_s19, %s3010_s24  ;;  %p3016_p10 = scmp.lt.s32.totalorder %s3009_s19, %s3977_s6 }
  0x97   : > { %p3017_p11 = scmp.lt.s32.totalorder %s3015_s4, %s3010_s24 }
  0x98   : > { %p3013_p7 = pnand %p3011_p4, %p3503_p8 }
  0x99   : > { %p3018_p12 = por %p3017_p11, %p3016_p10 }
  0x9a   : > { %p3014_p9 = pneg %p3013_p7 }
  0x9c   : > { %p3019_p13 = pnand %p3018_p12, %p3014_p9 }
  0x9e   : > { %3022 = shalt.err (!%p3019_p13)
}
  0x9f   : > { %2674 = dma.hbm_to_vmem [thread:$0]  (!%p3491_p6), %s3560_s29, 512, %s883_s28, [#allocation12], %s3274_s11, %s3274_s11, %s3275_s14  }
  0xa0   : > { %s3280_s1 = smov [#allocation14]   ;;  %s3038_s0 = sshra.s32 %s3574_s10, 4  ;;  %s3039_s0 = int_to_ptr.hbm [resolvable:$true] %s3038_s0 }
  0xa1   : > { %s905_s2 = sshll.u32 %s3280_s1, 4  ;;  %s3040_s19 = scalar_lea.hbm %s3039_s0, 32  ;;  %s906_s2 = int_to_ptr.vmem [resolvable:$true] %s905_s2 }
  0xa2   : > { %p3041_p0 = scmp.ne.s32.totalorder %s3039_s0, %s3040_s19  ;;  %s3045_s24 = scalar_lea.hbm %s3407_s20, 32 }
  0xa3   : > { %p3046_p7 = scmp.lt.s32.totalorder %s3039_s0, %s3407_s20  ;;  %p3047_p9 = scmp.lt.s32.totalorder %s3045_s24, %s3040_s19 }
  0xa4   : > { %p3043_p2 = pnand %p3041_p0, %p3503_p8 }
  0xa5   : > { %p3048_p10 = por %p3047_p9, %p3046_p7 }
  0xa6   : > { %p3044_p4 = pneg %p3043_p2 }
  0xa8   : > { %p3049_p11 = pnand %p3048_p10, %p3044_p4 }
  0xaa   : > { %3052 = shalt.err (!%p3049_p11)
}
  0xab   : > { %2677 = dma.hbm_to_vmem [thread:$0]  (!%p3491_p6), %s3574_s10, 512, %s906_s2, [#allocation15], %s3274_s11, %s3274_s11, %s3275_s14  }
  0xac   : > { %s3937_s9 = sadd.s32 4294967294, %s3240_s22   ;;  %s3600_s7 = sadd.s32 1, %s3240_s22  }
  0xad   : > { %s92_s29 = sadd.s32 1, %s3236_s18  ;;  %s89_s28 = ssub.s32 %s3240_s22, %s3600_s7 }
  0xae   : > { %p99_p8 = scmp.ne.s32.totalorder %s3236_s18, %s3232_s16  ;;  %p90_p12 = scmp.eq.s32.totalorder %s89_s28, 0 }
  0xaf   : > { %p100_p13 = scmp.eq.s32.totalorder %s3240_s22, 0  ;;  %p105_p0 = scmp.ne.s32.totalorder %s3232_s16, %s3228_s15 }
  0xb0   : > { %p701_p2 = scmp.eq.s32.totalorder %s3473_s23, 1  ;;  %p707_p7 = scmp.eq.s32.totalorder %s3937_s9, 1 }
  0xb1   : > { %s3612_s4 = scalar_select %p90_p12, %s3236_s18, %s92_s29  }
  0xb2   : > { %p3616_p4 = por %p3940_p1, %p105_p0  ;;  %p3620_p6 = por %p701_p2, %p99_p8 }
  0xb3   : > { %p101_p9 = por %p100_p13, %p99_p8  ;;  %s934_s11 = sand.u32 1, %s3236_s18  }
  0xb4   : > { %p3627_p10 = por %p707_p7, %p105_p0  ;;  %p2699_p11 = scmp.lt.s32.totalorder %s3240_s22, 2 }
  0xb5   : > { %s2545_s2 = sshll.u32 %s934_s11, 3  ;;  %s2546_s0 = sshll.u32 %s3240_s22, 3 }
  0xb6   : > { %s3984_s10 = scalar_select %p3627_p10, 1, 0 }
  0xb7   : > { %s942_s19 = scalar_lea.hbm %s3974_s5, %s2546_s0  ;;  %s938_s29 = scalar_lea.vmem [#allocation2], %s2545_s2 }
  0xb8   : > { %s944_s24 = sshll.u32 %s942_s19, 4  ;;  %s946_s28 = sshll.u32 %s938_s29, 4  ;;  %s945_s24 = int_to_ptr.hbm [resolvable:$true] %s944_s24  ;;  %s947_s28 = int_to_ptr.vmem [resolvable:$true] %s946_s28 }
  0xb9   : > { %p3634_p12 = pnand %p2699_p11, %p101_p9  ;;  %s935_s9 = scalar_lea.sflag [#allocation3], %s934_s11 }
  0xba   : > { %s3068_s8 = sshra.s32 %s945_s24, 4  ;;  %s3075_s0 = scalar_lea.hbm %s3974_s5, 16  ;;  %s3069_s8 = int_to_ptr.hbm [resolvable:$true] %s3068_s8 }
  0xbb   : > { %s3070_s12 = scalar_lea.hbm %s3069_s8, 8  ;;  %p3072_p13 = pneg %p3634_p12 }
  0xbc   : > { %p3071_p8 = scmp.ne.s32.totalorder %s3069_s8, %s3070_s12  ;;  %p3076_p7 = scmp.lt.s32.totalorder %s3069_s8, %s3974_s5 }
  0xbd   : > { %p3077_p5 = scmp.lt.s32.totalorder %s3075_s0, %s3070_s12 }
  0xbe   : > { %p3073_p0 = pnand %p3072_p13, %p3071_p8 }
  0xbf   : > { %p3078_p1 = por %p3077_p5, %p3076_p7 }
  0xc0   : > { %p3074_p2 = pneg %p3073_p0 }
  0xc2   : > { %p3079_p10 = pnand %p3078_p1, %p3074_p2 }
  0xc4   : > { %3082 = shalt.err (!%p3079_p10)
}
  0xc5   : > { %2681 = dma.hbm_to_vmem [thread:$0]  (!%p3634_p12), %s945_s24, 128, %s947_s28, %s935_s9  }
  0xc6   : > { %963 = sbr.rel (%p3478_p3) target bundleno = 3664 (0xe50), region = 132  ;;  %s3647_s11 = sand.u32 (!%p3478_p3), 1, %s3232_s16  }
  0xc7   : > { %s3941_s2 = sshll.u32 (!%p3478_p3), %s3647_s11, 3  ;;  %s966_s19 = scalar_lea.sflag (!%p3478_p3), [#allocation3], %s3647_s11 }
  0xc8   : > { %s969_s8 = scalar_lea.vmem (!%p3478_p3), [#allocation2], %s3941_s2 }
  0xcb   : > { %3199 = dma.done.wait (%p3616_p4), %s966_s19, 128  }
  0xcc   : > { %3201 = vsyncadd (%p3616_p4), %s966_s19, 4294967168  ;;  %p3986_p1 = scmp.eq.s32.totalorder %s3473_s23, 0 }
  0xce   : > { %3203 = dma.done.wait (%p3986_p1), [#allocation6], 1024   ;;  %p3987_p3 = pmov %p3986_p1 }
  0xcf   : > { %p3988_p5 = pmov %p3986_p1 }
  0xd0   : > { %3205 = vsyncadd (%p3987_p3), [#allocation6], 4294966272 }
  0xd1   : > { %3207 = dma.done.wait (%p3988_p5), [#allocation9], 1024   ;;  %p3989_p9 = pmov %p3986_p1 }
  0xd2   : > { %p3990_p10 = pmov %p3986_p1 }
  0xd3   : > { %3209 = vsyncadd (%p3989_p9), [#allocation9], 4294966272 }
  0xd4   : > { %3211 = dma.done.wait (%p3990_p10), [#allocation12], 1024   ;;  %p3991_p11 = pmov %p3986_p1 }
  0xd5   : > { %p3992_p4 = pmov %p3986_p1 }
  0xd6   : > { %3213 = vsyncadd (%p3991_p11), [#allocation12], 4294966272 }
  0xd7   : > { %3215 = dma.done.wait (%p3992_p4), [#allocation15], 512   ;;  %p3993_p12 = pmov %p3986_p1 }
  0xd8   : > { %v1140_v0 = vld [vmem:[%s3317_s21 + $0x18] sm:$0xff]  ;;  %v1139_v1 = vld [vmem:[%s3317_s21 + $0x10] sm:$0xff]  ;;  %v1138_v4 = vld [vmem:[%s3317_s21 + $0x8] sm:$0xff]  ;;  %vm1113_vm0 = vcmask 261120   ;;  %s3994_s17 = sld [smem:[#allocation30_spill]]  ;;  %vm1193_vm1 = vcmask 64512  }
  0xd9   : > { %3217 = vsyncadd (%p3993_p12), [#allocation15], 4294966784  ;;  %v1108_v2 = vld [vmem:[%s3973_s13 + $0x18] sm:$0xff]  ;;  %1157 = vmatpush.msra.mxu1 %v1140_v0  ;;  %v1107_v3 = vld [vmem:[%s3973_s13 + $0x10] sm:$0xff]  ;;  %s3995_s3 = sld [smem:[#allocation32_spill]]  ;;  %s3281_s6 = smov 120  }
  0xda   : > { %1129 = vmatpush.msra.mxu0 %v1108_v2  ;;  %v1106_v5 = vld [vmem:[%s3973_s13 + $0x8] sm:$0xff]  ;;  %v1137_v6 = vld [vmem:[%s3317_s21] sm:$0xff]  ;;  %v1166_v11 = vld [vmem:[#allocation5 + $0x8] sm:$0xff]  ;;  %s3282_s12 = smov 112   ;;  %s3283_s26 = smov 104  }
  0xdb   : > { %1158 = vmatpush.msra.mxu1 %v1139_v1  ;;  %v1168_v7 = vld [vmem:[#allocation5 + $0x18] sm:$0xff]  ;;  %v1167_v8 = vld [vmem:[#allocation5 + $0x10] sm:$0xff]  ;;  %v1165_v12 = vld [vmem:[#allocation5] sm:$0xff]  ;;  %s2557_s9 = sshll.u32 %s3647_s11, 5  ;;  %s3943_s24 = smov 8  }
  0xdc   : > { %1130 = vmatpush.msra.mxu0 %v1107_v3  ;;  %v3680_v9 = vld [vmem:[%s969_s8] sm:$0xff]  ;;  %1185 = vmatpush.msra.mxu2 %v1168_v7  ;;  %s3713_s1 = scalar_lea.vmem [#allocation17], %s2557_s9  ;;  %s3942_s29 = smov 24  }
  0xdd   : > { %v1105_v10 = vld [vmem:[%s3973_s13] sm:$0xff]  ;;  %1159 = vmatpush.msra.mxu1 %v1138_v4  ;;  %s3286_s28 = smov 16   ;;  %s3996_s0 = sld [smem:[#allocation34_spill]] }
  0xde   : > { %1131 = vmatpush.msra.mxu0 %v1106_v5  ;;  %1186 = vmatpush.msra.mxu2 %v1167_v8  ;;  %v2802_v13 = vld [vmem:[%s3322_s25] ss:$0 sm:$0xff]  ;;  %s3997_s19 = sld [smem:[#allocation28_spill]]  ;;  %p1097_p8 = scmp.lt.s32.totalorder %s3473_s23, 1 }
  0xdf   : > { %1160 = vmatpush.msra.mxu1 %v1137_v6  ;;  %v2803_v14 = vld [vmem:[%s3994_s17] ss:$0 sm:$0xff] }
  0xe0   : > { %1132 = vmatpush.msra.mxu0 %v1105_v10  ;;  %2562 = vmatmul.msk.f32.vlgmr.msra.gmra.mxu1 %vm1113_vm0, %v3680_v9  ;;  %v2804_v19 = vld [vmem:[%s3995_s3] ss:$0 sm:$0xff]  ;;  %s1098_s8 = scalar_select %p1097_p8, %s3473_s23, 1 }
  0xe1   : > { %2561 = vmatmul.msk.f32.vlgmr.msra.gmra.mxu0 %vm1113_vm0, %v3680_v9  ;;  %1187 = vmatpush.msra.mxu2 %v1166_v11 }
  0xe2   : > { %s2617_s2 = sshll.u32 %s1098_s8, 4  ;;  %s4002_s8 = sld [smem:[#allocation40_spill]] }
  0xe3   : > { %1188 = vmatpush.msra.mxu2 %v1165_v12 }
  0xe4   : > { %2563 = vmatmul.msk.f32.vlgmr.msra.gmra.mxu2 %vm1113_vm0, %v3680_v9 }
 0x15d   : > { %v1162_v15 = vpop.f32.mrf.mxu1 }
 0x15e   : > { %v1134_v16 = vpop.f32.mrf.mxu0  ;;  %v1163_v17 = vadd.f32 %v2802_v13, %v1162_v15 }
 0x15f   : > { %v1135_v18 = vadd.f32 %v2803_v14, %v1134_v16 }
 0x160   : > { %1272 = vrot.lane.b32.xlu2 %v1163_v17, %s3281_s6  ;;  %1355 = vrot.lane.b32.xlu1 %v1163_v17, %s3282_s12 }
 0x161   : > { %2564 = vmatpush.xpose.msk.msra.mxu3 %vm1193_vm1, %v1163_v17 }
 0x164   : > { %2565 = vmatmul.msk.f32.vlgmr.msra.gmra.mxu3 %vm1193_vm1, %v1135_v18 }
 0x167   : > { %v1190_v20 = vpop.f32.mrf.mxu2 }
 0x168   : > { %1270 = vrot.lane.b32.xlu2 %v1135_v18, %s3281_s6  ;;  %1353 = vrot.lane.b32.xlu1 %v1135_v18, %s3282_s12  ;;  %v3699_v21 = vadd.f32 %v2804_v19, %v1190_v20 }
 0x16a   : > { %1265 = vmatpush.msrb.mxu3 %v3699_v21 }
 0x170   : > { %1435 = vrot.lane.b32.xlu1 %v1135_v18, %s3283_s26 }
 0x1ba   : > { %v1273_v22 = vpop.permute.xlu2 %1272 }
 0x1bb   : > { %2567 = vmatpush.xpose.msk.msrb.mxu0 %vm1193_vm1, %v1273_v22 }
 0x1c2   : > { %v1271_v23 = vpop.permute.xlu2 %1270 }
 0x1c3   : > { %2568 = vmatmul.msk.f32.vlgmr.msrb.gmra.mxu0 %vm1193_vm1, %v1271_v23 }
 0x1d2   : > { %v1356_v24 = vpop.permute.xlu1 %1355 }
 0x1d3   : > { %2571 = vmatpush.xpose.msk.msra.mxu3 %vm1193_vm1, %v1356_v24 }
 0x1da   : > { %v1354_v46 = vpop.permute.xlu1 %1353 }
 0x1e2   : > { %v1436_v55 = vpop.permute.xlu1 %1435 }
 0x1e7   : > { %v1217_v25 = vpop.f32.mrf.mxu3 }
 0x1e8   : > { %v1220_v26 = vmul.f32 0.35355338, %v1217_v25 }
 0x1ea   : > { %v1221_v27 = vsel %vm1193_vm1, %v1220_v26, -inf }
 0x1eb   : > { %1222 = vmax.xlane.f32.xlu0 %v1221_v27 }
 0x240   : > { %v1295_v28 = vpop.f32.mrf.mxu0 }
 0x241   : > { %v1298_v29 = vmul.f32 0.35355338, %v1295_v28 }
 0x243   : > { %v1299_v30 = vsel %vm1193_vm1, %v1298_v29, -inf }
 0x244   : > { %1300 = vmax.xlane.f32.xlu2 %v1299_v30 }
 0x25e   : > { %v1223_v31 = vpop.xlane.xlu0 %1222 }
 0x25f   : > { %v1224_v32 = vsub.f32 %v1220_v26, %v1223_v31 }
 0x261   : > { %v1225_v33 = vmul.f32 1.442695, %v1224_v32 }
 0x263   : > { %2818 = vpow2.f32 %v1225_v33 }
 0x269   : > { %v2819_v34 = vpop.eup %2818 }
 0x26a   : > { %v1227_v35 = vsel %vm1193_vm1, %v2819_v34, 0.0 }
 0x26b   : > { %1228 = vadd.xlane.f32.xlu0 %v1227_v35 }
 0x27f   : > { %1437 = vrot.lane.b32.xlu0 %v1163_v17, %s3283_s26 }
 0x2b7   : > { %v1301_v36 = vpop.xlane.xlu2 %1300 }
 0x2b8   : > { %v1302_v37 = vsub.f32 %v1298_v29, %v1301_v36 }
 0x2ba   : > { %v1303_v38 = vmul.f32 1.442695, %v1302_v37 }
 0x2bc   : > { %2820 = vpow2.f32 %v1303_v38 }
 0x2c2   : > { %v2821_v39 = vpop.eup %2820 }
 0x2c3   : > { %v1305_v40 = vsel %vm1193_vm1, %v2821_v39, 0.0 }
 0x2c4   : > { %1306 = vadd.xlane.f32.xlu2 %v1305_v40 }
 0x2de   : > { %v1229_v41 = vpop.xlane.xlu0 %1228 }
 0x2df   : > { %2822 = vrcp.f32 %v1229_v41  ;;  %v1241_v45 = vand.u32 2147483648, %v1229_v41  ;;  %v1239_v48 = vand.u32 2147483647, %v1229_v41  ;;  %vm1235_vm3 = vweird.f32 %v1229_v41 }
 0x2e1   : > { %v1242_v50 = vor.u32 1.1754944e-38, %v1241_v45  ;;  %vm1240_vm5 = vcmp.eq.f32.partialorder %v1239_v48, 8.507059e+37 }
 0x2e5   : > { %v2823_v42 = vpop.eup %2822 }
 0x2e6   : > { %v1231_v43 = vmul.f32 %v2823_v42, %v1229_v41  ;;  %vm1236_vm2 = vweird.f32 %v2823_v42 }
 0x2e7   : > { %vm1237_vm4 = vmor %vm1235_vm3, %vm1236_vm2 }
 0x2e8   : > { %v1232_v44 = vsub.f32 1.0, %v1231_v43 }
 0x2ea   : > { %v1233_v47 = vmul.f32 %v2823_v42, %v1232_v44 }
 0x2ec   : > { %v1234_v49 = vadd.f32 %v2823_v42, %v1233_v47 }
 0x2ee   : > { %v1238_v51 = vsel %vm1237_vm4, %v2823_v42, %v1234_v49  ;;  %vm1530_vm4 = vcmask 130048  }
 0x2ef   : > { %v1243_v52 = vsel %vm1240_vm5, %v1242_v50, %v1238_v51  ;;  %vm1532_vm5 = vcmask 195584  }
 0x2f0   : > { %v1245_v53 = vmul.f32 %v2819_v34, %v1243_v52  ;;  %v1537_v52 = vld [vmem:[#allocation7 + $0x18] sm:$0xff] }
 0x2f1   : > { %v1438_v54 = vpop.permute.xlu0 %1437  ;;  %1557 = vmatpush.msrb.mxu2 %v1537_v52 }
 0x2f2   : > { %1246 = vst.msk [vmem:[%s3713_s1] sm:$0xff] %vm1193_vm1, %v1245_v53  ;;  %2566 = vmatmul.msk.f32.vlgmr.msrb.gmra.mxu3 %vm1193_vm1, %v1245_v53  ;;  %2575 = vmatpush.xpose.msk.msra.mxu0 %vm1193_vm1, %v1438_v54  ;;  %v1536_v53 = vld [vmem:[#allocation7 + $0x10] sm:$0xff]  ;;  %v1535_v54 = vld [vmem:[#allocation7 + $0x8] sm:$0xff] }
 0x2f3   : > { %1558 = vmatpush.msrb.mxu2 %v1536_v53 }
 0x2f5   : > { %2576 = vmatmul.msk.f32.vlgmr.msra.gmra.mxu0 %vm1193_vm1, %v1436_v55  ;;  %1559 = vmatpush.msrb.mxu2 %v1535_v54  ;;  %v1534_v55 = vld [vmem:[#allocation7] sm:$0xff] }
 0x2f7   : > { %1560 = vmatpush.msrb.mxu2 %v1534_v55 }
 0x2fa   : > { %2572 = vmatmul.msk.f32.vlgmr.msra.gmra.mxu3 %vm1193_vm1, %v1354_v46 }
 0x337   : > { %v1307_v56 = vpop.xlane.xlu2 %1306 }
 0x338   : > { %2824 = vrcp.f32 %v1307_v56  ;;  %v1319_v60 = vand.u32 2147483648, %v1307_v56  ;;  %v1317_v62 = vand.u32 2147483647, %v1307_v56  ;;  %vm1313_vm7 = vweird.f32 %v1307_v56 }
 0x33a   : > { %v1320_v0 = vor.u32 1.1754944e-38, %v1319_v60  ;;  %vm1318_vm9 = vcmp.eq.f32.partialorder %v1317_v62, 8.507059e+37  ;;  %v2805_v62 = vld [vmem:[%s3996_s0] ss:$0 sm:$0xff]  ;;  %s4000_s0 = sld [smem:[#allocation36_spill]] }
 0x33e   : > { %v2825_v57 = vpop.eup %2824 }
 0x33f   : > { %v1309_v58 = vmul.f32 %v2825_v57, %v1307_v56  ;;  %vm1314_vm6 = vweird.f32 %v2825_v57 }
 0x340   : > { %vm1315_vm8 = vmor %vm1313_vm7, %vm1314_vm6 }
 0x341   : > { %v1310_v59 = vsub.f32 1.0, %v1309_v58 }
 0x343   : > { %v1311_v61 = vmul.f32 %v2825_v57, %v1310_v59 }
 0x345   : > { %v1312_v63 = vadd.f32 %v2825_v57, %v1311_v61 }
 0x347   : > { %v1316_v1 = vsel %vm1315_vm8, %v2825_v57, %v1312_v63 }
 0x348   : > { %v1321_v2 = vsel %vm1318_vm9, %v1320_v0, %v1316_v1 }
 0x349   : > { %v1323_v3 = vmul.f32 %v2821_v39, %v1321_v2 }
 0x34b   : > { %2569 = vst.msk [vmem:[%s3713_s1 + $0x8] sm:$0xff] %vm1193_vm1, %v1323_v3 }
 0x372   : > { %v1460_v4 = vpop.f32.mrf.mxu0 }
 0x373   : > { %v1463_v5 = vmul.f32 0.35355338, %v1460_v4  ;;  %v1639_v4 = vld [vmem:[#allocation10 + $0x18] sm:$0xff] }
 0x374   : > { %1662 = vmatpush.msrb.mxu0 %v1639_v4 }
 0x375   : > { %v3723_v6 = vpop.f32.mrf.mxu3  ;;  %v1464_v7 = vsel %vm1193_vm1, %v1463_v5, -inf }
 0x376   : > { %1465 = vmax.xlane.f32.xlu0 %v1464_v7 }
 0x37d   : > { %v1378_v8 = vpop.f32.mrf.mxu3 }
 0x37e   : > { %v1381_v10 = vmul.f32 0.35355338, %v1378_v8  ;;  %v1636_v8 = vld [vmem:[#allocation10] sm:$0xff] }
 0x380   : > { %v1382_v11 = vsel %vm1193_vm1, %v1381_v10, -inf }
 0x381   : > { %1383 = vmax.xlane.f32.xlu1 %v1382_v11 }
 0x38a   : > { %1491 = vrot.lane.b32.xlu0 %v3699_v21, %s3283_s26 }
 0x3e9   : > { %v1466_v12 = vpop.xlane.xlu0 %1465 }
 0x3ea   : > { %v1467_v13 = vsub.f32 %v1463_v5, %v1466_v12  ;;  %v1638_v5 = vld [vmem:[#allocation10 + $0x10] sm:$0xff] }
 0x3eb   : > { %1663 = vmatpush.msrb.mxu0 %v1638_v5 }
 0x3ec   : > { %v1468_v14 = vmul.f32 1.442695, %v1467_v13 }
 0x3ee   : > { %2826 = vpow2.f32 %v1468_v14 }
 0x3f4   : > { %v2827_v15 = vpop.eup %2826  ;;  %v1384_v16 = vpop.xlane.xlu1 %1383 }
 0x3f5   : > { %v1385_v17 = vsub.f32 %v1381_v10, %v1384_v16  ;;  %v1470_v18 = vsel %vm1193_vm1, %v2827_v15, 0.0 }
 0x3f6   : > { %1471 = vadd.xlane.f32.xlu1 %v1470_v18 }
 0x3f7   : > { %v1386_v19 = vmul.f32 1.442695, %v1385_v17 }
 0x3f9   : > { %2828 = vpow2.f32 %v1386_v19 }
 0x3fc   : > { %v1492_v38 = vpop.permute.xlu0 %1491 }
 0x3ff   : > { %v2829_v20 = vpop.eup %2828 }
 0x400   : > { %v1388_v22 = vsel %vm1193_vm1, %v2829_v20, 0.0 }
 0x401   : > { %1389 = vadd.xlane.f32.xlu2 %v1388_v22  ;;  %v1608_v22 = vld [vmem:[#allocation8 + $0x18] sm:$0xff] }
 0x40f   : > { %1409 = vrot.lane.b32.xlu1 %v3699_v21, %s3282_s12 }
 0x419   : > { %1327 = vrot.lane.b32.xlu2 %v3699_v21, %s3281_s6 }
 0x469   : > { %v1472_v23 = vpop.xlane.xlu1 %1471 }
 0x46a   : > { %2830 = vrcp.f32 %v1472_v23  ;;  %v1484_v27 = vand.u32 2147483648, %v1472_v23  ;;  %v1482_v30 = vand.u32 2147483647, %v1472_v23  ;;  %vm1478_vm11 = vweird.f32 %v1472_v23 }
 0x46c   : > { %v1485_v32 = vor.u32 1.1754944e-38, %v1484_v27  ;;  %vm1483_vm13 = vcmp.eq.f32.partialorder %v1482_v30, 8.507059e+37 }
 0x470   : > { %v2831_v24 = vpop.eup %2830 }
 0x471   : > { %v1474_v25 = vmul.f32 %v2831_v24, %v1472_v23  ;;  %vm1479_vm10 = vweird.f32 %v2831_v24  ;;  %v1607_v23 = vld [vmem:[#allocation8 + $0x10] sm:$0xff] }
 0x472   : > { %vm1480_vm12 = vmor %vm1478_vm11, %vm1479_vm10 }
 0x473   : > { %v1475_v26 = vsub.f32 1.0, %v1474_v25  ;;  %v1605_v25 = vld [vmem:[#allocation8] sm:$0xff] }
 0x474   : > { %v1390_v28 = vpop.xlane.xlu2 %1389 }
 0x475   : > { %v1476_v29 = vmul.f32 %v2831_v24, %v1475_v26  ;;  %2832 = vrcp.f32 %v1390_v28  ;;  %v1402_v40 = vand.u32 2147483648, %v1390_v28  ;;  %v1400_v42 = vand.u32 2147483647, %v1390_v28 }
 0x476   : > { %vm1396_vm15 = vweird.f32 %v1390_v28 }
 0x477   : > { %v1477_v31 = vadd.f32 %v2831_v24, %v1476_v29  ;;  %v1403_v45 = vor.u32 1.1754944e-38, %v1402_v40  ;;  %vm1401_vm3 = vcmp.eq.f32.partialorder %v1400_v42, 8.507059e+37  ;;  %v2807_v42 = vld [vmem:[%s4000_s0] ss:$0 sm:$0xff]  ;;  %s4009_s0 = sld [smem:[#allocation47_spill]] }
 0x479   : > { %v1481_v33 = vsel %vm1480_vm12, %v2831_v24, %v1477_v31  ;;  %v1606_v24 = vld [vmem:[#allocation8 + $0x8] sm:$0xff] }
 0x47a   : > { %v1486_v34 = vsel %vm1483_vm13, %v1485_v32, %v1481_v33 }
 0x47b   : > { %v2833_v21 = vpop.eup %2832  ;;  %v1488_v35 = vmul.f32 %v2827_v15, %v1486_v34 }
 0x47c   : > { %v1392_v36 = vmul.f32 %v2833_v21, %v1390_v28  ;;  %v1328_v37 = vpop.permute.xlu2 %1327  ;;  %vm1397_vm14 = vweird.f32 %v2833_v21 }
 0x47d   : > { %1348 = vmatpush.msrb.mxu1 %v1328_v37  ;;  %2577 = vst.msk [vmem:[%s3713_s1 + $0x18] sm:$0xff] %vm1193_vm1, %v1488_v35  ;;  %vm1398_vm2 = vmor %vm1396_vm15, %vm1397_vm14 }
 0x47e   : > { %v1393_v39 = vsub.f32 1.0, %v1392_v36  ;;  %2570 = vmatmul.msk.f32.vlgmr.msrb.gmra.mxu1 %vm1193_vm1, %v1323_v3  ;;  %v3287_v3 = vmov 32.0  }
 0x47f   : > { %1512 = vmatpush.msra.mxu1 %v1492_v38  ;;  %2834 = vrcp.f32 %v3287_v3 }
 0x480   : > { %v1394_v41 = vmul.f32 %v2833_v21, %v1393_v39 }
 0x481   : > { %v1410_v43 = vpop.permute.xlu1 %1409 }
 0x482   : > { %v1395_v44 = vadd.f32 %v2833_v21, %v1394_v41  ;;  %1430 = vmatpush.msrb.mxu3 %v1410_v43 }
 0x484   : > { %v1399_v46 = vsel %vm1398_vm2, %v2833_v21, %v1395_v44  ;;  %1628 = vmatpush.msra.mxu3 %v1608_v22 }
 0x485   : > { %v1404_v47 = vsel %vm1401_vm3, %v1403_v45, %v1399_v46  ;;  %v2835_v7 = vpop.eup %2834 }
 0x486   : > { %2578 = vmatmul.msk.f32.vlgmr.msra.gmra.mxu1 %vm1193_vm1, %v1488_v35  ;;  %v1406_v48 = vmul.f32 %v2829_v20, %v1404_v47  ;;  %vm1576_vm6 = vweird.f32 %v2835_v7  ;;  %1629 = vmatpush.msra.mxu3 %v1607_v23 }
 0x488   : > { %2573 = vst.msk [vmem:[%s3713_s1 + $0x10] sm:$0xff] %vm1193_vm1, %v1406_v48  ;;  %2574 = vmatmul.msk.f32.vlgmr.msrb.gmra.mxu3 %vm1193_vm1, %v1406_v48 }
 0x489   : > { %1630 = vmatpush.msra.mxu3 %v1606_v24 }
 0x48b   : > { %1631 = vmatpush.msra.mxu3 %v1605_v25 }
 0x4fb   : > { %v1350_v49 = vpop.f32.mrf.mxu1 }
 0x4fc   : > { %1518 = vrot.lane.b32.xlu2 %v1350_v49, %s3943_s24 }
 0x503   : > { %v1514_v50 = vpop.f32.mrf.mxu1 }
 0x504   : > { %1526 = vrot.lane.b32.xlu1 %v1514_v50, %s3942_s29  ;;  %s1101_s29 = scalar_lea.vmem %s3997_s19, %s2617_s2  ;;  %s3998_s2 = sld [smem:[#allocation39_spill]] }
 0x505   : > { %v3756_v10 = vld [vmem:[%s1101_s29] sm:$0xff]  ;;  %v3760_v12 = vld [vmem:[%s1101_s29 + $0x8] sm:$0xff]  ;;  %s3999_s29 = sld [smem:[#allocation35_spill]] }
 0x506   : > { %s4001_s19 = sld [smem:[#allocation37_spill]] }
 0x50a   : > { %v2808_v26 = vld [vmem:[%s3998_s2] ss:$0 sm:$0xff]  ;;  %s3822_s2 = scalar_lea.vmem [#allocation19], %s2557_s9  ;;  %s4006_s9 = sld [smem:[#allocation43_spill]] }
 0x50b   : > { %v1432_v51 = vpop.f32.mrf.mxu3  ;;  %v2806_v39 = vld [vmem:[%s3999_s29] ss:$0 sm:$0xff]  ;;  %s4008_s29 = sld [smem:[#allocation45_spill]] }
 0x50c   : > { %1522 = vrot.lane.b32.xlu0 %v1432_v51, %s3286_s28  ;;  %v2809_v46 = vld [vmem:[%s4001_s19] ss:$0 sm:$0xff]  ;;  %s4010_s19 = sld [smem:[#allocation51_spill]] }
 0x512   : > { %s3118_s13 = scalar_lea.hbm %s4010_s19, 64 }
 0x556   : > { %v1519_v56 = vpop.permute.xlu2 %1518 }
 0x557   : > { %v1529_v57 = vsel %vm1193_vm1, %v3723_v6, %v1519_v56  ;;  %v1637_v6 = vld [vmem:[#allocation10 + $0x8] sm:$0xff] }
 0x558   : > { %1664 = vmatpush.msrb.mxu0 %v1637_v6 }
 0x55a   : > { %1665 = vmatpush.msrb.mxu0 %v1636_v8 }
 0x55b   : > { %2581 = vmatmul.msk.f32.vlgmr.msrb.gmra.mxu0 %vm1113_vm0, %v3756_v10 }
 0x563   : > { %2582 = vmatmul.msk.f32.gmra.mxu0 %vm1113_vm0, %v3760_v12 }
 0x576   : > { %v1527_v59 = vpop.permute.xlu1 %1526 }
 0x57e   : > { %v1523_v58 = vpop.permute.xlu0 %1522 }
 0x57f   : > { %v1531_v60 = vsel %vm1530_vm4, %v1529_v57, %v1523_v58 }
 0x580   : > { %v1533_v61 = vsel %vm1532_vm5, %v1531_v60, %v1527_v59  ;;  %v1676_v60 = vld [vmem:[#allocation11 + $0x18] sm:$0xff] }
 0x581   : > { %2579 = vmatmul.msk.f32.vlgmr.msrb.gmra.mxu2 %vm1113_vm0, %v1533_v61  ;;  %1693 = vmatpush.msrb.mxu1 %v1676_v60  ;;  %v1675_v61 = vld [vmem:[#allocation11 + $0x10] sm:$0xff] }
 0x583   : > { %1694 = vmatpush.msrb.mxu1 %v1675_v61 }
 0x5d8   : > { %v1667_v27 = vpop.f32.mrf.mxu0 }
 0x5d9   : > { %v1668_v28 = vadd.f32 %v2808_v26, %v1667_v27 }
 0x5e0   : > { %v1670_v32 = vpop.f32.mrf.mxu0 }
 0x5e1   : > { %v1671_v33 = vadd.f32 %v2808_v26, %v1670_v32 }
 0x5e3   : > { %1787 = vrot.lane.b32.xlu1 %v1671_v33, %s3281_s6  ;;  %2585 = vmatpush.xpose.msk.msra.mxu2 %vm1193_vm1, %v1671_v33 }
 0x5e7   : > { %2586 = vmatpush.xpose.msk.msra.mxu2 %vm1193_vm1, %v1668_v28 }
 0x5eb   : > { %1785 = vrot.lane.b32.xlu1 %v1668_v28, %s3281_s6 }
 0x5f3   : > { %1967 = vrot.lane.b32.xlu1 %v1671_v33, %s3283_s26 }
 0x604   : > { %v1562_v63 = vpop.f32.mrf.mxu2 }
 0x605   : > { %v1563_v0 = vadd.f32 %v2805_v62, %v1562_v63  ;;  %v1674_v62 = vld [vmem:[#allocation11 + $0x8] sm:$0xff]  ;;  %v1673_v63 = vld [vmem:[#allocation11] sm:$0xff] }
 0x606   : > { %1695 = vmatpush.msrb.mxu1 %v1674_v62 }
 0x607   : > { %v1565_v1 = vadd.f32 %v1563_v0, %v3680_v9  ;;  %v1572_v9 = vmul.f32 32.0, %v2835_v7 }
 0x608   : > { %1696 = vmatpush.msrb.mxu1 %v1673_v63 }
 0x609   : > { %v1568_v2 = vsel %vm1113_vm0, %v1565_v1, 0.0  ;;  %v1573_v11 = vsub.f32 1.0, %v1572_v9  ;;  %2583 = vmatmul.msk.f32.vlgmr.msrb.gmra.mxu1 %vm1113_vm0, %v3756_v10 }
 0x60a   : > { %1569 = vadd.xlane.f32.xlu2 %v1568_v2 }
 0x60b   : > { %v1574_v13 = vmul.f32 %v2835_v7, %v1573_v11 }
 0x60d   : > { %v1575_v14 = vadd.f32 %v2835_v7, %v1574_v13 }
 0x60f   : > { %v3764_v15 = vsel %vm1576_vm6, %v2835_v7, %v1575_v14 }
 0x611   : > { %2584 = vmatmul.msk.f32.gmra.mxu1 %vm1113_vm0, %v3760_v12 }
 0x655   : > { %v1788_v45 = vpop.permute.xlu1 %1787 }
 0x656   : > { %2589 = vmatpush.xpose.msk.msrb.mxu2 %vm1193_vm1, %v1788_v45 }
 0x65d   : > { %v1786_v49 = vpop.permute.xlu1 %1785 }
 0x65e   : > { %2590 = vmatpush.xpose.msk.msrb.mxu2 %vm1193_vm1, %v1786_v49 }
 0x665   : > { %v1968_v50 = vpop.permute.xlu1 %1967 }
 0x67d   : > { %v1570_v16 = vpop.xlane.xlu2 %1569 }
 0x67e   : > { %v1578_v17 = vmul.f32 %v3764_v15, %v1570_v16  ;;  %v2810_v16 = vld [vmem:[%s4002_s8] ss:$0 sm:$0xff]  ;;  %s4011_s8 = sld [smem:[#allocation52_spill]] }
 0x680   : > { %v1579_v18 = vsub.f32 %v1565_v1, %v1578_v17 }
 0x682   : > { %v1580_v19 = vmul.f32 %v1579_v18, %v1579_v18 }
 0x684   : > { %v1581_v20 = vsel %vm1113_vm0, %v1580_v19, 0.0 }
 0x685   : > { %1582 = vadd.xlane.f32.xlu0 %v1581_v20 }
 0x686   : > { %v1698_v14 = vpop.f32.mrf.mxu1 }
 0x687   : > { %v1699_v19 = vadd.f32 %v2810_v16, %v1698_v14 }
 0x68e   : > { %v1701_v17 = vpop.f32.mrf.mxu1 }
 0x699   : > { %1876 = vrot.lane.b32.xlu0 %v1668_v28, %s3282_s12 }
 0x6f8   : > { %v1583_v29 = vpop.xlane.xlu0 %1582 }
 0x6f9   : > { %v1584_v30 = vmul.f32 %v1583_v29, %v3764_v15 }
 0x6fb   : > { %v1585_v31 = vadd.f32 1e-05, %v1584_v30 }
 0x6fd   : > { %2836 = vrsqrt.f32 %v1585_v31  ;;  %vm1592_vm8 = vweird.f32 %v1585_v31 }
 0x703   : > { %v2837_v34 = vpop.eup %2836 }
 0x704   : > { %v1587_v21 = vmul.f32 %v2837_v34, %v1585_v31  ;;  %vm1593_vm7 = vweird.f32 %v2837_v34 }
 0x705   : > { %vm1594_vm9 = vmor %vm1592_vm8, %vm1593_vm7 }
 0x706   : > { %v1588_v35 = vmul.f32 %v2837_v34, %v1587_v21 }
 0x708   : > { %v1589_v36 = vmul.f32 0.5, %v1588_v35 }
 0x70a   : > { %v1590_v37 = vsub.f32 1.5, %v1589_v36 }
 0x70b   : > { %v1877_v57 = vpop.permute.xlu0 %1876 }
 0x70c   : > { %v1591_v38 = vmul.f32 %v2837_v34, %v1590_v37 }
 0x70e   : > { %v1595_v40 = vsel %vm1594_vm9, %v2837_v34, %v1591_v38 }
 0x70f   : > { %v1596_v41 = vmul.f32 %v1595_v40, %v1579_v18  ;;  %v1702_v18 = vadd.f32 %v2810_v16, %v1701_v17 }
 0x711   : > { %v1600_v43 = vmul.f32 %v2806_v39, %v1596_v41  ;;  %1777 = vmatpush.msrb.mxu3 %v1702_v18 }
 0x713   : > { %v3778_v44 = vadd.f32 %v2807_v42, %v1600_v43  ;;  %1778 = vmatpush.msrb.mxu3 %v1699_v19 }
 0x715   : > { %2580 = vmatmul.msk.f32.vlgmr.msra.gmra.mxu3 %vm1113_vm0, %v3778_v44 }
 0x798   : > { %v1633_v47 = vpop.f32.mrf.mxu3 }
 0x799   : > { %v1634_v48 = vadd.f32 %v2809_v46, %v1633_v47 }
 0x79b   : > { %1963 = vrot.lane.b32.xlu2 %v1634_v48, %s3283_s26  ;;  %1783 = vrot.lane.b32.xlu1 %v1634_v48, %s3281_s6 }
 0x79c   : > { %2587 = vmatmul.msk.f32.vlgmr.msra.gmra.mxu2 %vm1193_vm1, %v1634_v48 }
 0x79d   : > { %2599 = vmatpush.xpose.msk.msra.mxu2 %vm1193_vm1, %v1968_v50 }
 0x7a3   : > { %1965 = vrot.lane.b32.xlu1 %v1668_v28, %s3283_s26 }
 0x7ab   : > { %1878 = vrot.lane.b32.xlu1 %v1671_v33, %s3282_s12 }
 0x7b3   : > { %1874 = vrot.lane.b32.xlu1 %v1634_v48, %s3282_s12  ;;  %v2787_v48 = vpack.i.bf16 %v1699_v19, %v1702_v18 }
 0x7f5   : > { %v1964_v53 = vpop.permute.xlu2 %1963 }
 0x80d   : > { %v1784_v51 = vpop.permute.xlu1 %1783 }
 0x80e   : > { %2591 = vmatmul.msk.f32.vlgmr.msrb.gmra.mxu2 %vm1193_vm1, %v1784_v51 }
 0x815   : > { %v1966_v52 = vpop.permute.xlu1 %1965 }
 0x816   : > { %2600 = vmatpush.xpose.msk.msra.mxu2 %vm1193_vm1, %v1966_v52 }
 0x819   : > { %2601 = vmatmul.msk.f32.vlgmr.msra.gmra.mxu2 %vm1193_vm1, %v1964_v53 }
 0x81d   : > { %v1879_v54 = vpop.permute.xlu1 %1878 }
 0x81e   : > { %2594 = vmatpush.xpose.msk.msra.mxu0 %vm1193_vm1, %v1879_v54 }
 0x81f   : > { %v1730_v55 = vpop.f32.mrf.mxu2 }
 0x820   : > { %v1733_v56 = vmul.f32 0.35355338, %v1730_v55 }
 0x822   : > { %v1734_v58 = vsel %vm1530_vm4, %v1733_v56, -inf  ;;  %2595 = vmatpush.xpose.msk.msra.mxu0 %vm1193_vm1, %v1877_v57 }
 0x823   : > { %1735 = vmax.xlane.f32.xlu1 %v1734_v58 }
 0x825   : > { %v1875_v59 = vpop.permute.xlu1 %1874 }
 0x826   : > { %2596 = vmatmul.msk.f32.vlgmr.msra.gmra.mxu0 %vm1193_vm1, %v1875_v59 }
 0x891   : > { %v1812_v0 = vpop.f32.mrf.mxu2 }
 0x892   : > { %v1815_v1 = vmul.f32 0.35355338, %v1812_v0 }
 0x894   : > { %v1816_v2 = vsel %vm1530_vm4, %v1815_v1, -inf }
 0x895   : > { %1817 = vmax.xlane.f32.xlu0 %v1816_v2 }
 0x896   : > { %v1736_v3 = vpop.xlane.xlu1 %1735 }
 0x897   : > { %v1737_v4 = vsub.f32 %v1733_v56, %v1736_v3 }
 0x899   : > { %v1738_v5 = vmul.f32 1.442695, %v1737_v4 }
 0x89b   : > { %2838 = vpow2.f32 %v1738_v5 }
 0x89c   : > { %v1992_v6 = vpop.f32.mrf.mxu2 }
 0x89d   : > { %v1995_v7 = vmul.f32 0.35355338, %v1992_v6 }
 0x89f   : > { %v1996_v8 = vsel %vm1530_vm4, %v1995_v7, -inf }
 0x8a0   : > { %1997 = vmax.xlane.f32.xlu2 %v1996_v8 }
 0x8a1   : > { %v2839_v9 = vpop.eup %2838 }
 0x8a2   : > { %v1740_v10 = vsel %vm1530_vm4, %v2839_v9, 0.0 }
 0x8a3   : > { %1741 = vadd.xlane.f32.xlu0 %v1740_v10  ;;  %v1903_v11 = vpop.f32.mrf.mxu0 }
 0x8a4   : > { %v1906_v12 = vmul.f32 0.35355338, %v1903_v11 }
 0x8a6   : > { %v1907_v13 = vsel %vm1530_vm4, %v1906_v12, -inf }
 0x8a7   : > { %1908 = vmax.xlane.f32.xlu1 %v1907_v13 }
 0x908   : > { %v1818_v20 = vpop.xlane.xlu0 %1817 }
 0x909   : > { %v1819_v22 = vsub.f32 %v1815_v1, %v1818_v20 }
 0x90b   : > { %v1820_v23 = vmul.f32 1.442695, %v1819_v22 }
 0x90d   : > { %2840 = vpow2.f32 %v1820_v23 }
 0x913   : > { %v3808_v24 = vpop.eup %2840  ;;  %v1998_v25 = vpop.xlane.xlu2 %1997 }
 0x914   : > { %v1999_v26 = vsub.f32 %v1995_v7, %v1998_v25  ;;  %v1822_v27 = vsel %vm1530_vm4, %v3808_v24, 0.0 }
 0x915   : > { %1823 = vadd.xlane.f32.xlu2 %v1822_v27 }
 0x916   : > { %v2000_v28 = vmul.f32 1.442695, %v1999_v26  ;;  %v1742_v29 = vpop.xlane.xlu0 %1741 }
 0x917   : > { %2842 = vrcp.f32 %v1742_v29  ;;  %v1754_v37 = vand.u32 2147483648, %v1742_v29  ;;  %v1752_v39 = vand.u32 2147483647, %v1742_v29  ;;  %vm1748_vm11 = vweird.f32 %v1742_v29 }
 0x918   : > { %2844 = vpow2.f32 %v2000_v28 }
 0x919   : > { %v1755_v42 = vor.u32 1.1754944e-38, %v1754_v37  ;;  %vm1753_vm13 = vcmp.eq.f32.partialorder %v1752_v39, 8.507059e+37  ;;  %v2068_v37 = vld [vmem:[#allocation13 + $0x8] sm:$0xff] }
 0x91a   : > { %v1909_v30 = vpop.xlane.xlu1 %1908 }
 0x91b   : > { %v1910_v31 = vsub.f32 %v1906_v12, %v1909_v30 }
 0x91d   : > { %v2843_v32 = vpop.eup %2842  ;;  %v1911_v33 = vmul.f32 1.442695, %v1910_v31 }
 0x91e   : > { %v3812_v34 = vpop.eup %2844  ;;  %v1744_v21 = vmul.f32 %v2843_v32, %v1742_v29  ;;  %vm1749_vm10 = vweird.f32 %v2843_v32 }
 0x91f   : > { %2846 = vpow2.f32 %v1911_v33  ;;  %v2002_v35 = vsel %vm1530_vm4, %v3812_v34, 0.0  ;;  %vm1750_vm12 = vmor %vm1748_vm11, %vm1749_vm10 }
 0x920   : > { %v1745_v36 = vsub.f32 1.0, %v1744_v21  ;;  %2003 = vadd.xlane.f32.xlu1 %v2002_v35  ;;  %v2070_v35 = vld [vmem:[#allocation13 + $0x18] sm:$0xff] }
 0x921   : > { %2090 = vmatpush.msrb.mxu0 %v2070_v35 }
 0x922   : > { %v1746_v38 = vmul.f32 %v2843_v32, %v1745_v36  ;;  %v2069_v36 = vld [vmem:[#allocation13 + $0x10] sm:$0xff] }
 0x923   : > { %2091 = vmatpush.msrb.mxu0 %v2069_v36 }
 0x924   : > { %v1747_v40 = vadd.f32 %v2843_v32, %v1746_v38  ;;  %v2067_v38 = vld [vmem:[#allocation13] sm:$0xff] }
 0x925   : > { %v3816_v41 = vpop.eup %2846  ;;  %2092 = vmatpush.msrb.mxu0 %v2068_v37 }
 0x926   : > { %v1751_v43 = vsel %vm1750_vm12, %v2843_v32, %v1747_v40  ;;  %v1913_v45 = vsel %vm1530_vm4, %v3816_v41, 0.0 }
 0x927   : > { %v1756_v46 = vsel %vm1753_vm13, %v1755_v42, %v1751_v43  ;;  %1914 = vadd.xlane.f32.xlu0 %v1913_v45  ;;  %2093 = vmatpush.msrb.mxu0 %v2067_v38 }
 0x928   : > { %v1758_v47 = vmul.f32 %v2839_v9, %v1756_v46 }
 0x92a   : > { %1759 = vst.msk [vmem:[%s3822_s2] sm:$0xff] %vm1530_vm4, %v1758_v47  ;;  %2588 = vmatmul.msk.f32.vlgmr.msrb.gmra.mxu3 %vm1530_vm4, %v1758_v47 }
 0x92d   : > { %2788 = vrot.lane.b32.xlu2 %v2787_v48, %s3281_s6  ;;  %s4003_s6 = smov 24  }
 0x939   : > { %2793 = vrot.lane.b32.xlu1 %v2787_v48, %s3283_s26  ;;  %s4005_s26 = sld [smem:[#allocation46_spill]] }
 0x93b   : > { %2798 = vrot.lane.b32.xlu0 %v2787_v48, %s3282_s12  ;;  %s4004_s12 = sld [smem:[#allocation42_spill]] }
 0x941   : > { %v2811_v46 = vld [vmem:[%s4004_s12] ss:$0 sm:$0xff]  ;;  %s2618_s12 = sshll.u32 %s3473_s23, 5 }
 0x988   : > { %v1824_v49 = vpop.xlane.xlu2 %1823 }
 0x989   : > { %2848 = vrcp.f32 %v1824_v49  ;;  %v1836_v55 = vand.u32 2147483648, %v1824_v49  ;;  %v1834_v59 = vand.u32 2147483647, %v1824_v49  ;;  %vm1830_vm15 = vweird.f32 %v1824_v49 }
 0x98b   : > { %v1837_v61 = vor.u32 1.1754944e-38, %v1836_v55  ;;  %vm1835_vm3 = vcmp.eq.f32.partialorder %v1834_v59, 8.507059e+37  ;;  %v2170_v59 = vld [vmem:[%s4005_s26 + $0x38] sm:$0xff] }
 0x98c   : > { %2187 = vmatpush.msrb.mxu2 %v2170_v59 }
 0x98f   : > { %v2849_v50 = vpop.eup %2848 }
 0x990   : > { %v1826_v51 = vmul.f32 %v2849_v50, %v1824_v49  ;;  %v2789_v52 = vpop.permute.xlu2 %2788  ;;  %vm1831_vm14 = vweird.f32 %v2849_v50 }
 0x991   : > { %v2790_v53 = vunpack.i.l.bf16 %v2789_v52  ;;  %v2791_v56 = vunpack.i.h.bf16 %v2789_v52  ;;  %vm1832_vm2 = vmor %vm1830_vm15, %vm1831_vm14  ;;  %vm2175_vm14 = vcmask 523264  }
 0x992   : > { %v1827_v54 = vsub.f32 1.0, %v1826_v51 }
 0x993   : > { %v2004_v57 = vpop.xlane.xlu1 %2003  ;;  %1868 = vmatpush.msra.mxu3 %v2790_v53 }
 0x994   : > { %v1828_v58 = vmul.f32 %v2849_v50, %v1827_v54  ;;  %2850 = vrcp.f32 %v2004_v57  ;;  %v2016_v5 = vand.u32 2147483648, %v2004_v57  ;;  %v2014_v7 = vand.u32 2147483647, %v2004_v57 }
 0x995   : > { %1869 = vmatpush.msra.mxu3 %v2791_v56  ;;  %vm2010_vm7 = vweird.f32 %v2004_v57  ;;  %v2134_v56 = vld [vmem:[#allocation14 + $0x18] sm:$0xff] }
 0x996   : > { %v1829_v60 = vadd.f32 %v2849_v50, %v1828_v58  ;;  %v2017_v10 = vor.u32 1.1754944e-38, %v2016_v5  ;;  %vm2015_vm9 = vcmp.eq.f32.partialorder %v2014_v7, 8.507059e+37  ;;  %v2131_v58 = vld [vmem:[#allocation14] sm:$0xff] }
 0x998   : > { %v1833_v62 = vsel %vm1832_vm2, %v2849_v50, %v1829_v60  ;;  %v2169_v60 = vld [vmem:[%s4005_s26 + $0x30] sm:$0xff] }
 0x999   : > { %v1838_v63 = vsel %vm1835_vm3, %v1837_v61, %v1833_v62  ;;  %v2168_v61 = vld [vmem:[%s4005_s26 + $0x28] sm:$0xff]  ;;  %2188 = vmatpush.msrb.mxu2 %v2169_v60 }
 0x99a   : > { %v2851_v0 = vpop.eup %2850  ;;  %v1915_v1 = vpop.xlane.xlu0 %1914  ;;  %v1840_v2 = vmul.f32 %v3808_v24, %v1838_v63 }
 0x99b   : > { %v2006_v3 = vmul.f32 %v2851_v0, %v2004_v57  ;;  %2852 = vrcp.f32 %v1915_v1  ;;  %vm2011_vm6 = vweird.f32 %v2851_v0  ;;  %v1927_v16 = vand.u32 2147483648, %v1915_v1  ;;  %v2133_v57 = vld [vmem:[#allocation14 + $0x10] sm:$0xff]  ;;  %2189 = vmatpush.msrb.mxu2 %v2168_v61 }
 0x99c   : > { %2592 = vst.msk [vmem:[%s3822_s2 + $0x8] sm:$0xff] %vm1530_vm4, %v1840_v2  ;;  %2593 = vmatmul.msk.f32.vlgmr.msra.gmra.mxu3 %vm1530_vm4, %v1840_v2  ;;  %vm2012_vm8 = vmor %vm2010_vm7, %vm2011_vm6  ;;  %v1925_v19 = vand.u32 2147483647, %v1915_v1  ;;  %vm1921_vm11 = vweird.f32 %v1915_v1  ;;  %v2166_v2 = vld [vmem:[%s4005_s26 + $0x18] sm:$0xff] }
 0x99d   : > { %v2007_v4 = vsub.f32 1.0, %v2006_v3  ;;  %v1928_v22 = vor.u32 1.1754944e-38, %v1927_v16  ;;  %v2165_v16 = vld [vmem:[%s4005_s26 + $0x10] sm:$0xff] }
 0x99e   : > { %vm1926_vm13 = vcmp.eq.f32.partialorder %v1925_v19, 8.507059e+37  ;;  %v2814_v19 = vld [vmem:[%s4008_s29] ss:$0 sm:$0xff] }
 0x99f   : > { %v2008_v6 = vmul.f32 %v2851_v0, %v2007_v4 }
 0x9a1   : > { %v2853_v8 = vpop.eup %2852  ;;  %v2009_v9 = vadd.f32 %v2851_v0, %v2008_v6 }
 0x9a2   : > { %v1917_v11 = vmul.f32 %v2853_v8, %v1915_v1  ;;  %vm1922_vm10 = vweird.f32 %v2853_v8 }
 0x9a3   : > { %v2013_v12 = vsel %vm2012_vm8, %v2851_v0, %v2009_v9  ;;  %vm1923_vm12 = vmor %vm1921_vm11, %vm1922_vm10  ;;  %v2167_v0 = vld [vmem:[%s4005_s26 + $0x20] sm:$0xff] }
 0x9a4   : > { %v2018_v13 = vsel %vm2015_vm9, %v2017_v10, %v2013_v12  ;;  %v1918_v14 = vsub.f32 1.0, %v1917_v11  ;;  %2190 = vmatpush.msrb.mxu2 %v2167_v0  ;;  %v2812_v9 = vld [vmem:[%s4006_s9] ss:$0 sm:$0xff]  ;;  %s2269_s9 = scalar_lea.hbm %s4010_s19, %s2618_s12 }
 0x9a5   : > { %v2020_v17 = vmul.f32 %v3812_v34, %v2018_v13  ;;  %s2272_s29 = sshll.u32 %s2269_s9, 4  ;;  %s2273_s29 = int_to_ptr.hbm [resolvable:$true] %s2272_s29 }
 0x9a6   : > { %v1919_v18 = vmul.f32 %v2853_v8, %v1918_v14  ;;  %2191 = vmatpush.msrb.mxu2 %v2166_v2  ;;  %s3112_s3 = sshra.s32 %s2273_s29, 4  ;;  %s3113_s3 = int_to_ptr.hbm [resolvable:$true] %s3112_s3 }
 0x9a7   : > { %2602 = vst.msk [vmem:[%s3822_s2 + $0x18] sm:$0xff] %vm1530_vm4, %v2020_v17  ;;  %s3114_s5 = scalar_lea.hbm %s3113_s3, 32  ;;  %p3119_p7 = scmp.lt.s32.totalorder %s3113_s3, %s4010_s19 }
 0x9a8   : > { %v1920_v20 = vadd.f32 %v2853_v8, %v1919_v18  ;;  %2192 = vmatpush.msrb.mxu2 %v2165_v16  ;;  %v2163_v18 = vld [vmem:[%s4005_s26] sm:$0xff]  ;;  %p3115_p13 = scmp.ne.s32.totalorder %s3113_s3, %s3114_s5  ;;  %p3120_p1 = scmp.lt.s32.totalorder %s3118_s13, %s3114_s5 }
 0x9aa   : > { %v1924_v23 = vsel %vm1923_vm12, %v2853_v8, %v1920_v20  ;;  %p3116_p0 = pnand %p3115_p13, %p3620_p6  ;;  %p3121_p3 = por %p3120_p1, %p3119_p7 }
 0x9ab   : > { %v1929_v24 = vsel %vm1926_vm13, %v1928_v22, %v1924_v23  ;;  %v2794_v25 = vpop.permute.xlu1 %2793 }
 0x9ac   : > { %v2795_v26 = vunpack.i.l.bf16 %v2794_v25  ;;  %v1931_v27 = vmul.f32 %v3816_v41, %v1929_v24  ;;  %v2796_v29 = vunpack.i.h.bf16 %v2794_v25  ;;  %v2815_v24 = vld [vmem:[%s4009_s0] ss:$0 sm:$0xff]  ;;  %s2286_s0 = scalar_lea.hbm %s4011_s8, %s2618_s12  ;;  %p3117_p2 = pneg %p3116_p0 }
 0x9ad   : > { %v2799_v28 = vpop.permute.xlu0 %2798  ;;  %v1780_v32 = vpop.f32.mrf.mxu3 }
 0x9ae   : > { %v2800_v30 = vunpack.i.l.bf16 %v2799_v28  ;;  %2046 = vmatpush.msrb.mxu3 %v2795_v26  ;;  %2597 = vst.msk [vmem:[%s3822_s2 + $0x10] sm:$0xff] %vm1530_vm4, %v1931_v27  ;;  %v2801_v31 = vunpack.i.h.bf16 %v2799_v28  ;;  %p3122_p5 = pnand %p3121_p3, %p3117_p2 }
 0x9b0   : > { %1957 = vmatpush.msra.mxu1 %v2800_v30  ;;  %2047 = vmatpush.msrb.mxu3 %v2796_v29 }
 0x9b1   : > { %2603 = vmatmul.msk.f32.vlgmr.msrb.gmra.mxu3 %vm1530_vm4, %v2020_v17  ;;  %v2164_v17 = vld [vmem:[%s4005_s26 + $0x8] sm:$0xff] }
 0x9b2   : > { %1958 = vmatpush.msra.mxu1 %v2801_v31  ;;  %2193 = vmatpush.msrb.mxu2 %v2164_v17 }
 0x9b3   : > { %2598 = vmatmul.msk.f32.vlgmr.msra.gmra.mxu1 %vm1530_vm4, %v1931_v27 }
 0x9b4   : > { %2154 = vmatpush.msrb.mxu1 %v2134_v56  ;;  %2194 = vmatpush.msrb.mxu2 %v2163_v18 }
 0x9b6   : > { %2155 = vmatpush.msrb.mxu1 %v2133_v57 }
 0xa1f   : > { %v1871_v33 = vpop.f32.mrf.mxu3 }
 0xa20   : > { %2053 = vrot.lane.b32.xlu2 %v1871_v33, %s3943_s24 }
 0xa30   : > { %v1960_v34 = vpop.f32.mrf.mxu1 }
 0xa31   : > { %2057 = vrot.lane.b32.xlu0 %v1960_v34, %s3286_s28  ;;  %s4007_s28 = sld [smem:[#allocation44_spill]] }
 0xa34   : > { %v2049_v21 = vpop.f32.mrf.mxu3 }
 0xa35   : > { %2061 = vrot.lane.b32.xlu1 %v2049_v21, %s4003_s6  ;;  %s2238_s6 = sand.u32 1, %s3473_s23  }
 0xa36   : > { %s3876_s24 = scalar_lea.sflag [#allocation18], %s2238_s6 }
 0xa37   : > { %v2813_v12 = vld [vmem:[%s4007_s28] ss:$0 sm:$0xff]  ;;  %s2270_s28 = sshll.u32 %s3713_s1, 4  ;;  %s2271_s28 = int_to_ptr.vmem [resolvable:$true] %s2270_s28 }
 0xa7a   : > { %v2054_v39 = vpop.permute.xlu2 %2053 }
 0xa7b   : > { %v2064_v41 = vsel %vm1193_vm1, %v1780_v32, %v2054_v39 }
 0xaa3   : > { %v2058_v40 = vpop.permute.xlu0 %2057 }
 0xaa4   : > { %v2065_v42 = vsel %vm1530_vm4, %v2064_v41, %v2058_v40 }
 0xaa7   : > { %v2062_v43 = vpop.permute.xlu1 %2061 }
 0xaa8   : > { %v2066_v45 = vsel %vm1532_vm5, %v2065_v42, %v2062_v43 }
 0xaa9   : > { %2604 = vmatmul.msk.f32.vlgmr.msrb.gmra.mxu0 %vm1113_vm0, %v2066_v45 }
 0xb26   : > { %v2095_v47 = vpop.f32.mrf.mxu0 }
 0xb27   : > { %v2096_v48 = vadd.f32 %v2811_v46, %v2095_v47 }
 0xb29   : > { %v2098_v49 = vadd.f32 %v2096_v48, %v3778_v44  ;;  %v2132_v44 = vld [vmem:[#allocation14 + $0x8] sm:$0xff] }
 0xb2a   : > { %2156 = vmatpush.msrb.mxu1 %v2132_v44 }
 0xb2b   : > { %v2101_v50 = vsel %vm1113_vm0, %v2098_v49, 0.0 }
 0xb2c   : > { %2102 = vadd.xlane.f32.xlu2 %v2101_v50  ;;  %2157 = vmatpush.msrb.mxu1 %v2131_v58 }
 0xb9f   : > { %v2103_v51 = vpop.xlane.xlu2 %2102 }
 0xba0   : > { %v2104_v52 = vmul.f32 %v2103_v51, %v3764_v15 }
 0xba2   : > { %v2105_v53 = vsub.f32 %v2098_v49, %v2104_v52 }
 0xba4   : > { %v2106_v54 = vmul.f32 %v2105_v53, %v2105_v53 }
 0xba6   : > { %v2107_v55 = vsel %vm1113_vm0, %v2106_v54, 0.0 }
 0xba7   : > { %2108 = vadd.xlane.f32.xlu0 %v2107_v55 }
 0xc1a   : > { %v2109_v62 = vpop.xlane.xlu0 %2108 }
 0xc1b   : > { %v2110_v63 = vmul.f32 %v2109_v62, %v3764_v15 }
 0xc1d   : > { %v2111_v1 = vadd.f32 1e-05, %v2110_v63 }
 0xc1f   : > { %2854 = vrsqrt.f32 %v2111_v1  ;;  %vm2118_vm4 = vweird.f32 %v2111_v1 }
 0xc25   : > { %v2855_v3 = vpop.eup %2854 }
 0xc26   : > { %v2113_v4 = vmul.f32 %v2855_v3, %v2111_v1  ;;  %vm2119_vm1 = vweird.f32 %v2855_v3 }
 0xc27   : > { %vm2120_vm5 = vmor %vm2118_vm4, %vm2119_vm1 }
 0xc28   : > { %v2114_v5 = vmul.f32 %v2855_v3, %v2113_v4 }
 0xc2a   : > { %v2115_v6 = vmul.f32 0.5, %v2114_v5 }
 0xc2c   : > { %v2116_v7 = vsub.f32 1.5, %v2115_v6 }
 0xc2e   : > { %v2117_v8 = vmul.f32 %v2855_v3, %v2116_v7 }
 0xc30   : > { %v2121_v10 = vsel %vm2120_vm5, %v2855_v3, %v2117_v8 }
 0xc31   : > { %v2122_v11 = vmul.f32 %v2121_v10, %v2105_v53 }
 0xc33   : > { %v2126_v13 = vmul.f32 %v2812_v9, %v2122_v11 }
 0xc35   : > { %v2130_v14 = vadd.f32 %v2813_v12, %v2126_v13 }
 0xc37   : > { %2605 = vmatmul.msk.f32.vlgmr.msrb.gmra.mxu1 %vm1113_vm0, %v2130_v14 }
 0xcb4   : > { %v2159_v20 = vpop.f32.mrf.mxu1 }
 0xcb5   : > { %v2160_v22 = vadd.f32 %v2814_v19, %v2159_v20 }
 0xcb7   : > { %v2162_v23 = vmax.f32 %v2160_v22, 0.0 }
 0xcb9   : > { %2606 = vmatmul.msk.f32.vlgmr.msrb.gmra.mxu2 %vm2175_vm14, %v2162_v23 }
 0xd3c   : > { %v2196_v25 = vpop.f32.mrf.mxu2 }
 0xd3d   : > { %v2197_v26 = vadd.f32 %v2815_v24, %v2196_v25 }
 0xd3f   : > { %v2199_v27 = vadd.f32 %v2197_v26, %v2130_v14 }
 0xd41   : > { %v2202_v28 = vsel %vm1113_vm0, %v2199_v27, 0.0 }
 0xd42   : > { %2203 = vadd.xlane.f32.xlu1 %v2202_v28 }
 0xdb5   : > { %v2204_v29 = vpop.xlane.xlu1 %2203 }
 0xdb6   : > { %v2205_v30 = vmul.f32 %v2204_v29, %v3764_v15 }
 0xdb8   : > { %v2206_v31 = vsub.f32 %v2199_v27, %v2205_v30 }
 0xdba   : > { %v2207_v32 = vmul.f32 %v2206_v31, %v2206_v31 }
 0xdbc   : > { %v2208_v33 = vsel %vm1113_vm0, %v2207_v32, 0.0 }
 0xdbd   : > { %2209 = vadd.xlane.f32.xlu2 %v2208_v33 }
 0xdbe   : > { %3125 = shalt.err (!%p3122_p5)
}
 0xdbf   : > { %s3288_s1 = smov 128   ;;  %s4012_s9 = smov 8  }
 0xdc0   : > { %2651 = dma.vmem_to_hbm [thread:$0]  (%p3620_p6), %s2271_s28, 512, %s2273_s29, %s3876_s24, %s3288_s1, %s3288_s1, %s4012_s9  }
 0xdc1   : > { %s2289_s6 = sshll.u32 %s2286_s0, 4  ;;  %s2287_s12 = sshll.u32 %s3822_s2, 4  ;;  %s2290_s6 = int_to_ptr.hbm [resolvable:$true] %s2289_s6  ;;  %s2288_s12 = int_to_ptr.vmem [resolvable:$true] %s2287_s12 }
 0xdc2   : > { %s3140_s17 = sshra.s32 %s2290_s6, 4  ;;  %s3146_s13 = scalar_lea.hbm %s4011_s8, 64  ;;  %s3141_s17 = int_to_ptr.hbm [resolvable:$true] %s3140_s17 }
 0xdc3   : > { %s3142_s5 = scalar_lea.hbm %s3141_s17, 32  ;;  %p3147_p4 = scmp.lt.s32.totalorder %s3141_s17, %s4011_s8 }
 0xdc4   : > { %p3143_p9 = scmp.ne.s32.totalorder %s3141_s17, %s3142_s5  ;;  %p3148_p12 = scmp.lt.s32.totalorder %s3146_s13, %s3142_s5 }
 0xdc6   : > { %p3144_p10 = pnand %p3143_p9, %p3620_p6  ;;  %p3149_p8 = por %p3148_p12, %p3147_p4 }
 0xdc8   : > { %p3145_p11 = pneg %p3144_p10 }
 0xdca   : > { %p3150_p13 = pnand %p3149_p8, %p3145_p11 }
 0xdcc   : > { %3153 = shalt.err (!%p3150_p13)
}
 0xdcd   : > { %s4013_s3 = sld [smem:[#allocation48_spill]]  ;;  %s2610_s17 = sshll.u32 %s3473_s23, 3 }
 0xdce   : > { %2652 = dma.vmem_to_hbm [thread:$0]  (%p3620_p6), %s2288_s12, 512, %s2290_s6, %s3876_s24, %s3288_s1, %s3288_s1, %s4012_s9  }
 0xdcf   : > { %s4014_s2 = sld [smem:[#allocation50_spill]]  ;;  %s4016_s29 = sshll.u32 %s3647_s11, 3 }
 0xdd0   : > { %s4015_s28 = sld [smem:[#allocation49_spill]]  ;;  %s1082_s0 = scalar_lea.vmem [#allocation16], %s4016_s29 }
 0xdd1   : > { %s2256_s1 = sshll.u32 %s1082_s0, 4  ;;  %s2234_s23 = scalar_lea.sflag [#allocation4], %s3647_s11  ;;  %s2257_s1 = int_to_ptr.vmem [resolvable:$true] %s2256_s1 }
 0xdd3   : > { %v2816_v42 = vld [vmem:[%s4013_s3] ss:$0 sm:$0xff] }
 0xdd5   : > { %s2254_s24 = scalar_lea.hbm %s4014_s2, %s2610_s17  ;;  %s3174_s5 = scalar_lea.hbm %s4014_s2, 16 }
 0xdd6   : > { %v2817_v45 = vld [vmem:[%s4015_s28] ss:$0 sm:$0xff]  ;;  %s2258_s9 = sshll.u32 %s2254_s24, 4  ;;  %s2259_s9 = int_to_ptr.hbm [resolvable:$true] %s2258_s9 }
 0xdd7   : > { %s3168_s6 = sshra.s32 %s2259_s9, 4  ;;  %s3169_s6 = int_to_ptr.hbm [resolvable:$true] %s3168_s6 }
 0xdd8   : > { %s3170_s12 = scalar_lea.hbm %s3169_s6, 8  ;;  %p3175_p1 = scmp.lt.s32.totalorder %s3169_s6, %s4014_s2 }
 0xdd9   : > { %p3171_p0 = scmp.ne.s32.totalorder %s3169_s6, %s3170_s12  ;;  %p3176_p3 = scmp.lt.s32.totalorder %s3174_s5, %s3170_s12 }
 0xddb   : > { %p3172_p2 = pnand %p3171_p0, %p3620_p6  ;;  %p3177_p5 = por %p3176_p3, %p3175_p1 }
 0xddd   : > { %p3173_p7 = pneg %p3172_p2 }
 0xddf   : > { %p3178_p9 = pnand %p3177_p5, %p3173_p7 }
 0xe30   : > { %v2210_v34 = vpop.xlane.xlu2 %2209 }
 0xe31   : > { %v2211_v21 = vmul.f32 %v2210_v34, %v3764_v15 }
 0xe33   : > { %v2212_v35 = vadd.f32 1e-05, %v2211_v21 }
 0xe35   : > { %2856 = vrsqrt.f32 %v2212_v35  ;;  %vm2219_vm2 = vweird.f32 %v2212_v35 }
 0xe3b   : > { %v2857_v36 = vpop.eup %2856 }
 0xe3c   : > { %v2214_v37 = vmul.f32 %v2857_v36, %v2212_v35  ;;  %vm2220_vm15 = vweird.f32 %v2857_v36 }
 0xe3d   : > { %vm2221_vm3 = vmor %vm2219_vm2, %vm2220_vm15 }
 0xe3e   : > { %v2215_v38 = vmul.f32 %v2857_v36, %v2214_v37 }
 0xe40   : > { %v2216_v39 = vmul.f32 0.5, %v2215_v38 }
 0xe42   : > { %v2217_v40 = vsub.f32 1.5, %v2216_v39 }
 0xe44   : > { %v2218_v41 = vmul.f32 %v2857_v36, %v2217_v40 }
 0xe46   : > { %v2222_v43 = vsel %vm2221_vm3, %v2857_v36, %v2218_v41 }
 0xe47   : > { %v2223_v15 = vmul.f32 %v2222_v43, %v2206_v31 }
 0xe49   : > { %v2227_v46 = vmul.f32 %v2816_v42, %v2223_v15 }
 0xe4b   : > { %v2231_v47 = vadd.f32 %v2817_v45, %v2227_v46 }
 0xe4d   : > { %2232 = vst.msk [vmem:[%s1082_s0] sm:$0xff] %vm1113_vm0, %v2231_v47 }
 0xe4e   : > { %3181 = shalt.err (!%p3178_p9)
}
 0xe4f   : > { %2650 = dma.vmem_to_hbm [thread:$0]  (%p3620_p6), %s2257_s1, 128, %s2259_s9, %s2234_s23  }
 0xe50 PF: > { %s2304_s11 = sand.u32 1, %s3228_s15   ;;  %p4017_p10 = scmp.ne.s32.totalorder %s3984_s10, 0 }
 0xe51   : > { %p4018_p11 = scmp.ge.s32.totalorder %s3240_s22, 2  ;;  %s2305_s13 = scalar_lea.sflag [#allocation4], %s2304_s11 }
 0xe53   : > { %p2683_p4 = pnand %p4018_p11, %p4017_p10 }
 0xe55   : > { %p2684_p12 = pneg %p2683_p4 }
 0xe57   : > { %3219 = dma.done.wait (%p2684_p12), %s2305_s13, 128  }
 0xe58   : > { %3221 = vsyncadd (%p2684_p12), %s2305_s13, 4294967168  ;;  %s4019_s3 = sadd.s32 4294967294, %s3240_s22  }
 0xe59   : > { %s2314_s28 = sand.u32 1, %s4019_s3  }
 0xe5a   : > { %s2315_s17 = scalar_lea.sflag [#allocation18], %s2314_s28 }
 0xe5b   : > { %3223 = dma.done.wait (%p2684_p12), %s2315_s17, 1024  }
 0xe5c   : > { %3225 = vsyncadd (%p2684_p12), %s2315_s17, 4294966272  ;;  %p82_p6 = scmp.ge.s32.totalorder %s3600_s7, 4   ;;  %s4020_s15 = smov %s3232_s16 }
 0xe5d   : > { %s4021_s16 = smov %s3236_s18  ;;  %s4022_s18 = smov %s3612_s4 }
 0xe5e   : > { %s4023_s22 = smov %s3600_s7  ;;  %84 = sbr.rel (!%p82_p6) target bundleno = 71 (0x47), region = 276 }
 0xe63   :  { %2331 = vsyncpa [#allocation3], 1 }
 0xe64   :  { %2333 = vsyncpa [#allocation3 + $0x1], 1 }
 0xe65   :  { %2334 = vsyncpa [#allocation6], 1 }
 0xe66   :  { %2335 = vsyncpa [#allocation9], 1 }
 0xe67   :  { %2336 = vsyncpa [#allocation12], 1 }
 0xe68   :  { %2337 = vsyncpa [#allocation15], 1 }
 0xe69   :  { %2338 = vsyncpa [#allocation4], 1 }
 0xe6a   :  { %2340 = vsyncpa [#allocation4 + $0x1], 1 }
 0xe6b   :  { %2341 = vsyncpa [#allocation18], 1 }
 0xe6c   :  { %2343 = vsyncpa [#allocation18 + $0x1], 1 }

</bundles_post_ra>
